<compile_context>
chip_gen: v5e
topology: v5e:2x2
jax: 0.10.0
libtpu: 0.0.40
codegen_flags: <defaults>
</compile_context>

<pallas_src>
import functools

import jax
import jax.numpy as jnp
import numpy as np
from jax.experimental import pallas as pl
from jax.experimental.pallas import tpu as pltpu


def _round_up(x, m):
    return ((x + m - 1) // m) * m


def _elu(x):
    # ELU(alpha=1): x if x > 0 else exp(x) - 1   (clamp arg to avoid inf in untaken branch)
    return jnp.where(x > 0, x, jnp.exp(jnp.minimum(x, 0.0)) - 1.0)


def _sigmoid(x):
    # 1 / (1 + exp(-x)) with the divide on the EUP reciprocal path.
    return pl.reciprocal(1.0 + jnp.exp(-x), approx=True)


def iaf_kernel(z_ref, h_ref,
               hw_w_ref, hw_b_ref,           # fused highway weights/biases
               hflow_w_ref, hflow_b_ref,     # fused h-side flow weights/biases (all depths, m||s)
               zflow_w_ref,                  # fused z-side flow weights (per depth, m||s)
               z_out_ref, ld_out_ref,
               *, tanh_flag, C):
    mm_dtype = hw_w_ref.dtype                       # matmul operand dtype (bf16)
    n_highway = hw_w_ref.shape[0]
    depth = zflow_w_ref.shape[0]
    Z = z_ref.shape[0]
    H = h_ref.shape[0]

    z = z_ref[...].astype(jnp.float32)              # (Z, TB)  batch on lanes
    h = h_ref[...].astype(jnp.float32)              # (H, TB)

    # ---- Highway network on h: ONE fused (3H, H) matmul per layer ----
    for l in range(n_highway):
        pre = jnp.dot(hw_w_ref[l], h.astype(mm_dtype),
                      preferred_element_type=jnp.float32) + hw_b_ref[l]     # (3H, TB)
        gate = _sigmoid(pre[0:H, :])
        nonlin = _elu(pre[H:2 * H, :])
        linear = pre[2 * H:3 * H, :]
        h = gate * nonlin + (1.0 - gate) * linear

    # ---- h-side contributions for every depth and both (m, s): ONE matmul, hoisted
    #      out of the sequential z dependency chain ----
    h_side = jnp.dot(hflow_w_ref[...], h.astype(mm_dtype),
                     preferred_element_type=jnp.float32) + hflow_b_ref[...]  # (2*depth*Z, TB)

    # ---- sequential IAF flow steps (depth is small -> unrolled) ----
    log_det_pos = jnp.zeros((1, z.shape[1]), dtype=jnp.float32)
    for d in range(depth):
        # rows [0:Z] -> m pre-activation, rows [Z:2Z] -> s pre-activation
        pre = jnp.dot(zflow_w_ref[d], z.astype(mm_dtype),
                      preferred_element_type=jnp.float32) \
            + h_side[2 * Z * d:2 * Z * (d + 1), :]                           # (2Z, TB)

        a = _elu(pre)                         # shared ELU exp over m||s
        e = jnp.exp(-a)                       # shared exp over m||s
        denom = 1.0 + e
        sig = pl.reciprocal(denom, approx=True)   # shared reciprocal over m||s
        m = sig[0:Z, :]
        s = sig[Z:2 * Z, :]
        # log(s) = -log(1 + exp(-a_s)); a_s = ELU(.) >= -1 so this is safe. Exact log of
        # the exact denominator (only the approx reciprocal feeds the z update).
        log_s = -jnp.log(denom[Z:2 * Z, :])

        z = s * z + (1.0 - s) * m
        log_det_pos = log_det_pos + jnp.sum(log_s, axis=0, keepdims=True)    # (1, TB)

    if tanh_flag:
        z = jnp.tanh(z * (1.0 / C)) * C

    z_out_ref[...] = z.astype(z_out_ref.dtype)
    # Lane-dense, sublane-aligned store: broadcast the (1, TB) row to a full (8, TB) slab.
    ld_out_ref[...] = jnp.broadcast_to(log_det_pos, ld_out_ref.shape).astype(ld_out_ref.dtype)


def _prepare_params(params, z_size, mm_dtype):
    """Host-side prep: tril(-1) mask the autoregressive weights, split z/h blocks,
    fuse along the output axis, transpose for the batch-on-lanes layout, cast to bf16."""
    gw, gb, nw, nb, lw, lb, mw, mb, sw, sb = [np.asarray(p, np.float32) for p in params]
    n_highway, H, _ = gw.shape
    depth, zh, Z = mw.shape
    assert Z == z_size and zh == Z + H

    # keep W[i, j] iff j < i  (== torch.tril(W, -1)); all-ones on the h rows (i >= Z > j).
    mask = (np.arange(Z)[None, :] < np.arange(zh)[:, None]).astype(np.float32)
    mw_m = mw * mask
    sw_m = sw * mask

    # Highway: fuse gate/nonlin/linear along the output axis, transpose -> (L, 3H, H).
    hw_w = np.concatenate([gw, nw, lw], axis=2).transpose(0, 2, 1)
    hw_b = np.concatenate([gb, nb, lb], axis=1)[:, :, None]                   # (L, 3H, 1)

    # z-side flow weights: fuse (m, s) along the output axis, transpose -> (D, 2Z, Z).
    zflow_w = np.concatenate([mw_m[:, :Z, :], sw_m[:, :Z, :]], axis=2).transpose(0, 2, 1)

    # h-side flow weights: fuse (m, s) per depth and stack over depth -> (2*D*Z, H).
    hflow_w = np.concatenate(
        [np.concatenate([mw_m[d, Z:, :], sw_m[d, Z:, :]], axis=1) for d in range(depth)],
        axis=1).T
    hflow_b = np.concatenate(
        [np.concatenate([mb[d], sb[d]]) for d in range(depth)])[:, None]      # (2*D*Z, 1)

    return (jnp.asarray(hw_w, mm_dtype), jnp.asarray(hw_b, jnp.float32),
            jnp.asarray(hflow_w, mm_dtype), jnp.asarray(hflow_b, jnp.float32),
            jnp.asarray(zflow_w, mm_dtype))


def iaf_forward(z, h, params, *, tanh_flag=False, C=100.0,
                mm_dtype=jnp.bfloat16, block_b=None):
    """z: (B, Z) f32, h: (B, H) f32. Returns (z_out (B, Z), log_det (B,))."""
    B, Z = z.shape
    H = h.shape[1]
    prepped = _prepare_params(params, Z, mm_dtype)

    # --- batch tile: batch lives on the LANE axis, so tiles are multiples of 128.
    #     Small batch -> one big tile (grid steps are pure overhead on 1-TC v5e/v6e);
    #     large batch -> >=2 tiles so the "parallel" axis feeds both v7x TensorCores.
    if block_b is None:
        block_b = _round_up(max(128, -(-B // 2)), 128) if B > 256 else 4096
    tb = max(128, min(_round_up(block_b, 128), _round_up(B, 128)))
    B_pad = _round_up(B, tb)
    n_tiles = B_pad // tb

    # Transpose so batch is the last (lane) dim; pad batch up to the tile multiple.
    zT = jnp.pad(z.T, ((0, 0), (0, B_pad - B)))       # (Z, B_pad)
    hT = jnp.pad(h.T, ((0, 0), (0, B_pad - B)))       # (H, B_pad)

    batch_spec = lambda rows: pl.BlockSpec((rows, tb), lambda i: (0, i))
    const_spec = lambda arr: pl.BlockSpec(arr.shape, lambda i, _nd=arr.ndim: (0,) * _nd)

    in_specs = [batch_spec(Z), batch_spec(H)] + [const_spec(p) for p in prepped]
    out_specs = (batch_spec(Z),                                  # z_out: (Z, B_pad)
                 pl.BlockSpec((8, tb), lambda i: (0, i)))        # log_det slab: (8, B_pad)

    # Explicit VMEM budget: resident weights + double-buffered batch tiles + headroom.
    # Clamp well below physical VMEM (v7x has only 64 MiB per TC).
    param_bytes = sum(int(np.prod(p.shape)) * p.dtype.itemsize for p in prepped)
    tile_bytes = tb * (2 * Z + H + 8) * 4
    vmem_limit = int(min(48 << 20, max(16 << 20, 2 * param_bytes + 4 * tile_bytes + (4 << 20))))

    kernel = functools.partial(iaf_kernel, tanh_flag=tanh_flag, C=float(C))

    z_out_T, ld = pl.pallas_call(
        kernel,
        out_shape=(jax.ShapeDtypeStruct((Z, B_pad), jnp.float32),
                   jax.ShapeDtypeStruct((8, B_pad), jnp.float32)),
        grid=(n_tiles,),
        in_specs=in_specs,
        out_specs=out_specs,
        compiler_params=pltpu.CompilerParams(
            dimension_semantics=("parallel",),
            vmem_limit_bytes=vmem_limit),
    )(zT, hT, *prepped)
    return z_out_T.T[:B], ld[0, :B]


def init_params(key, z_size, h_size, depth, n_highway=3, scale=0.1):
    """Deterministic synthetic parameter init (shapes match the PyTorch module)."""
    zh = z_size + h_size
    ks = jax.random.split(key, 12)
    p = dict(
        gw=scale * jax.random.normal(ks[0], (n_highway, h_size, h_size), jnp.float32),
        gb=scale * jax.random.normal(ks[1], (n_highway, h_size), jnp.float32),
        nw=scale * jax.random.normal(ks[2], (n_highway, h_size, h_size), jnp.float32),
        nb=scale * jax.random.normal(ks[3], (n_highway, h_size), jnp.float32),
        lw=scale * jax.random.normal(ks[4], (n_highway, h_size, h_size), jnp.float32),
        lb=scale * jax.random.normal(ks[5], (n_highway, h_size), jnp.float32),
        mw=scale * jax.random.normal(ks[6], (depth, zh, z_size), jnp.float32),
        mb=scale * jax.random.normal(ks[7], (depth, z_size), jnp.float32),
        sw=scale * jax.random.normal(ks[8], (depth, zh, z_size), jnp.float32),
        sb=scale * jax.random.normal(ks[9], (depth, z_size), jnp.float32),
    )
    return (p["gw"], p["gb"], p["nw"], p["nb"], p["lw"], p["lb"],
            p["mw"], p["mb"], p["sw"], p["sb"])


def iaf_reference(z, h, params, *, tanh_flag=False, C=100.0, mm_dtype=jnp.float32):
    """Pure-JAX reference mirroring the PyTorch forward (concat + tril(-1) weights).
    `mm_dtype` applies the same matmul-operand precision the kernel uses."""
    gw, gb, nw, nb, lw, lb, mw, mb, sw, sb = params
    dot = lambda a, b: jnp.dot(a.astype(mm_dtype), b.astype(mm_dtype),
                               preferred_element_type=jnp.float32)
    elu = lambda x: jnp.where(x > 0, x, jnp.exp(jnp.minimum(x, 0.0)) - 1.0)
    sig = lambda x: 1.0 / (1.0 + jnp.exp(-x))
    for l in range(gw.shape[0]):
        gate = sig(dot(h, gw[l]) + gb[l])
        h = gate * elu(dot(h, nw[l]) + nb[l]) + (1.0 - gate) * (dot(h, lw[l]) + lb[l])
    depth, zh, zs = mw.shape
    mask = (np.arange(zs)[None, :] < np.arange(zh)[:, None]).astype(np.float32)
    ld = jnp.zeros((z.shape[0],), jnp.float32)
    for d in range(depth):
        inp = jnp.concatenate([z, h], axis=1)
        m = sig(elu(dot(inp, mw[d] * mask) + mb[d]))
        s = sig(elu(dot(inp, sw[d] * mask) + sb[d]))
        z = s * z + (1.0 - s) * m
        ld = ld + jnp.sum(jnp.log(s), axis=1)
    if tanh_flag:
        z = jnp.tanh(z / C) * C
    return z, ld


if __name__ == "__main__":
    B, Z, H, DEPTH = 72, 16, 32, 3   # B not a tile multiple -> exercises the padding path

    key = jax.random.PRNGKey(0)
    k_z, k_h, k_p = jax.random.split(key, 3)
    z_in = jax.random.normal(k_z, (B, Z), jnp.float32)
    h_in = jax.random.normal(k_h, (B, H), jnp.float32)
    params = init_params(k_p, Z, H, DEPTH)

    for flag in (False, True):
        z_out, log_det = iaf_forward(z_in, h_in, params, tanh_flag=flag, C=100.0)
        jax.block_until_ready((z_out, log_det))

        z_ref, ld_ref = iaf_reference(z_in, h_in, params, tanh_flag=flag, C=100.0,
                                      mm_dtype=jnp.bfloat16)
        np.testing.assert_allclose(np.asarray(z_out), np.asarray(z_ref), rtol=2e-2, atol=2e-2)
        np.testing.assert_allclose(np.asarray(log_det), np.asarray(ld_ref), rtol=2e-2, atol=2e-1)

    print("KERNEL_OK")
</pallas_src>

<mosaic_0001>
module attributes {stable_mosaic.version = 11 : i64} {
  func.func @iaf_kernel(%arg0: i32, %arg1: memref<16x128xf32, #tpu.memory_space<vmem>>, %arg2: memref<32x128xf32, #tpu.memory_space<vmem>>, %arg3: memref<3x96x32xbf16, #tpu.memory_space<vmem>>, %arg4: memref<3x96x1xf32, #tpu.memory_space<vmem>>, %arg5: memref<96x32xbf16, #tpu.memory_space<vmem>>, %arg6: memref<96x1xf32, #tpu.memory_space<vmem>>, %arg7: memref<3x32x16xbf16, #tpu.memory_space<vmem>>, %arg8: memref<16x128xf32, #tpu.memory_space<vmem>>, %arg9: memref<8x128xf32, #tpu.memory_space<vmem>>) attributes {dimension_semantics = [#tpu.dimension_semantics<parallel>], iteration_bounds = array<i64: 1>, scalar_prefetch = 0 : i64, scratch_operands = 0 : i64, tpu.core_type = #tpu.core_type<tc>, window_params = [{transform_indices = @transform_0, window_bounds = array<i64: 16, 128>}, {transform_indices = @transform_1, window_bounds = array<i64: 32, 128>}, {pipeline_mode = #tpu.pipeline_mode<synchronous>, transform_indices = @transform_2, window_bounds = array<i64: 3, 96, 32>}, {pipeline_mode = #tpu.pipeline_mode<synchronous>, transform_indices = @transform_3, window_bounds = array<i64: 3, 96, 1>}, {pipeline_mode = #tpu.pipeline_mode<synchronous>, transform_indices = @transform_4, window_bounds = array<i64: 96, 32>}, {pipeline_mode = #tpu.pipeline_mode<synchronous>, transform_indices = @transform_5, window_bounds = array<i64: 96, 1>}, {pipeline_mode = #tpu.pipeline_mode<synchronous>, transform_indices = @transform_6, window_bounds = array<i64: 3, 32, 16>}, {transform_indices = @transform_7, window_bounds = array<i64: 16, 128>}, {transform_indices = @transform_8, window_bounds = array<i64: 8, 128>}]} {
    %c0 = arith.constant 0 : index
    %c0_0 = arith.constant 0 : index
    %0 = vector.load %arg1[%c0, %c0_0] : memref<16x128xf32, #tpu.memory_space<vmem>>, vector<16x128xf32>
    %c0_1 = arith.constant 0 : index
    %c0_2 = arith.constant 0 : index
    %1 = vector.load %arg2[%c0_1, %c0_2] : memref<32x128xf32, #tpu.memory_space<vmem>>, vector<32x128xf32>
    %c0_3 = arith.constant 0 : index
    %c0_4 = arith.constant 0 : index
    %c0_5 = arith.constant 0 : index
    %2 = vector.load %arg3[%c0_3, %c0_4, %c0_5] : memref<3x96x32xbf16, #tpu.memory_space<vmem>>, vector<1x96x32xbf16>
    %3 = vector.shape_cast %2 : vector<1x96x32xbf16> to vector<96x32xbf16>
    %4 = arith.truncf %1 : vector<32x128xf32> to vector<32x128xbf16>
    %cst = arith.constant dense<0.000000e+00> : vector<96x128xf32>
    %5 = tpu.matmul %3, %4, %cst {dimension_numbers = #tpu.dot_dimension_numbers<[1], [0], [0], [1], [0, 0, 1, 1], [], []>} : vector<96x32xbf16>, vector<32x128xbf16>, vector<96x128xf32> -> vector<96x128xf32>
    %c0_6 = arith.constant 0 : index
    %c0_7 = arith.constant 0 : index
    %c0_8 = arith.constant 0 : index
    %6 = vector.load %arg4[%c0_6, %c0_7, %c0_8] : memref<3x96x1xf32, #tpu.memory_space<vmem>>, vector<1x96x1xf32>
    %7 = vector.shape_cast %6 : vector<1x96x1xf32> to vector<96x1xf32>
    %8 = vector.broadcast %7 : vector<96x1xf32> to vector<96x128xf32>
    %9 = arith.addf %5, %8 : vector<96x128xf32>
    %10 = vector.extract_strided_slice %9 {offsets = [0, 0], sizes = [32, 128], strides = [1, 1]} : vector<96x128xf32> to vector<32x128xf32>
    %cst_9 = arith.constant 0.000000e+00 : f32
    %11 = vector.broadcast %cst_9 : f32 to vector<32x128xf32>
    %12 = arith.subf %11, %10 : vector<32x128xf32>
    %13 = math.exp %12 : vector<32x128xf32>
    %cst_10 = arith.constant 1.000000e+00 : f32
    %14 = vector.broadcast %cst_10 : f32 to vector<32x128xf32>
    %15 = arith.addf %14, %13 : vector<32x128xf32>
    %16 = tpu.reciprocal %15 {approx = true} : vector<32x128xf32> -> vector<32x128xf32>
    %17 = vector.extract_strided_slice %9 {offsets = [32, 0], sizes = [32, 128], strides = [1, 1]} : vector<96x128xf32> to vector<32x128xf32>
    %cst_11 = arith.constant 0.000000e+00 : f32
    %18 = vector.broadcast %cst_11 : f32 to vector<32x128xf32>
    %19 = arith.cmpf ogt, %17, %18 : vector<32x128xf32>
    %cst_12 = arith.constant 0.000000e+00 : f32
    %20 = vector.broadcast %cst_12 : f32 to vector<32x128xf32>
    %21 = arith.minimumf %17, %20 : vector<32x128xf32>
    %22 = math.exp %21 : vector<32x128xf32>
    %cst_13 = arith.constant 1.000000e+00 : f32
    %23 = vector.broadcast %cst_13 : f32 to vector<32x128xf32>
    %24 = arith.subf %22, %23 : vector<32x128xf32>
    %25 = arith.select %19, %17, %24 : vector<32x128xi1>, vector<32x128xf32>
    %26 = vector.extract_strided_slice %9 {offsets = [64, 0], sizes = [32, 128], strides = [1, 1]} : vector<96x128xf32> to vector<32x128xf32>
    %27 = arith.mulf %16, %25 : vector<32x128xf32>
    %cst_14 = arith.constant 1.000000e+00 : f32
    %28 = vector.broadcast %cst_14 : f32 to vector<32x128xf32>
    %29 = arith.subf %28, %16 : vector<32x128xf32>
    %30 = arith.mulf %29, %26 : vector<32x128xf32>
    %31 = arith.addf %27, %30 : vector<32x128xf32>
    %c1 = arith.constant 1 : index
    %c0_15 = arith.constant 0 : index
    %c0_16 = arith.constant 0 : index
    %32 = vector.load %arg3[%c1, %c0_15, %c0_16] : memref<3x96x32xbf16, #tpu.memory_space<vmem>>, vector<1x96x32xbf16>
    %33 = vector.shape_cast %32 : vector<1x96x32xbf16> to vector<96x32xbf16>
    %34 = arith.truncf %31 : vector<32x128xf32> to vector<32x128xbf16>
    %cst_17 = arith.constant dense<0.000000e+00> : vector<96x128xf32>
    %35 = tpu.matmul %33, %34, %cst_17 {dimension_numbers = #tpu.dot_dimension_numbers<[1], [0], [0], [1], [0, 0, 1, 1], [], []>} : vector<96x32xbf16>, vector<32x128xbf16>, vector<96x128xf32> -> vector<96x128xf32>
    %c1_18 = arith.constant 1 : index
    %c0_19 = arith.constant 0 : index
    %c0_20 = arith.constant 0 : index
    %36 = vector.load %arg4[%c1_18, %c0_19, %c0_20] : memref<3x96x1xf32, #tpu.memory_space<vmem>>, vector<1x96x1xf32>
    %37 = vector.shape_cast %36 : vector<1x96x1xf32> to vector<96x1xf32>
    %38 = vector.broadcast %37 : vector<96x1xf32> to vector<96x128xf32>
    %39 = arith.addf %35, %38 : vector<96x128xf32>
    %40 = vector.extract_strided_slice %39 {offsets = [0, 0], sizes = [32, 128], strides = [1, 1]} : vector<96x128xf32> to vector<32x128xf32>
    %cst_21 = arith.constant 0.000000e+00 : f32
    %41 = vector.broadcast %cst_21 : f32 to vector<32x128xf32>
    %42 = arith.subf %41, %40 : vector<32x128xf32>
    %43 = math.exp %42 : vector<32x128xf32>
    %cst_22 = arith.constant 1.000000e+00 : f32
    %44 = vector.broadcast %cst_22 : f32 to vector<32x128xf32>
    %45 = arith.addf %44, %43 : vector<32x128xf32>
    %46 = tpu.reciprocal %45 {approx = true} : vector<32x128xf32> -> vector<32x128xf32>
    %47 = vector.extract_strided_slice %39 {offsets = [32, 0], sizes = [32, 128], strides = [1, 1]} : vector<96x128xf32> to vector<32x128xf32>
    %cst_23 = arith.constant 0.000000e+00 : f32
    %48 = vector.broadcast %cst_23 : f32 to vector<32x128xf32>
    %49 = arith.cmpf ogt, %47, %48 : vector<32x128xf32>
    %cst_24 = arith.constant 0.000000e+00 : f32
    %50 = vector.broadcast %cst_24 : f32 to vector<32x128xf32>
    %51 = arith.minimumf %47, %50 : vector<32x128xf32>
    %52 = math.exp %51 : vector<32x128xf32>
    %cst_25 = arith.constant 1.000000e+00 : f32
    %53 = vector.broadcast %cst_25 : f32 to vector<32x128xf32>
    %54 = arith.subf %52, %53 : vector<32x128xf32>
    %55 = arith.select %49, %47, %54 : vector<32x128xi1>, vector<32x128xf32>
    %56 = vector.extract_strided_slice %39 {offsets = [64, 0], sizes = [32, 128], strides = [1, 1]} : vector<96x128xf32> to vector<32x128xf32>
    %57 = arith.mulf %46, %55 : vector<32x128xf32>
    %cst_26 = arith.constant 1.000000e+00 : f32
    %58 = vector.broadcast %cst_26 : f32 to vector<32x128xf32>
    %59 = arith.subf %58, %46 : vector<32x128xf32>
    %60 = arith.mulf %59, %56 : vector<32x128xf32>
    %61 = arith.addf %57, %60 : vector<32x128xf32>
    %c2 = arith.constant 2 : index
    %c0_27 = arith.constant 0 : index
    %c0_28 = arith.constant 0 : index
    %62 = vector.load %arg3[%c2, %c0_27, %c0_28] : memref<3x96x32xbf16, #tpu.memory_space<vmem>>, vector<1x96x32xbf16>
    %63 = vector.shape_cast %62 : vector<1x96x32xbf16> to vector<96x32xbf16>
    %64 = arith.truncf %61 : vector<32x128xf32> to vector<32x128xbf16>
    %cst_29 = arith.constant dense<0.000000e+00> : vector<96x128xf32>
    %65 = tpu.matmul %63, %64, %cst_29 {dimension_numbers = #tpu.dot_dimension_numbers<[1], [0], [0], [1], [0, 0, 1, 1], [], []>} : vector<96x32xbf16>, vector<32x128xbf16>, vector<96x128xf32> -> vector<96x128xf32>
    %c2_30 = arith.constant 2 : index
    %c0_31 = arith.constant 0 : index
    %c0_32 = arith.constant 0 : index
    %66 = vector.load %arg4[%c2_30, %c0_31, %c0_32] : memref<3x96x1xf32, #tpu.memory_space<vmem>>, vector<1x96x1xf32>
    %67 = vector.shape_cast %66 : vector<1x96x1xf32> to vector<96x1xf32>
    %68 = vector.broadcast %67 : vector<96x1xf32> to vector<96x128xf32>
    %69 = arith.addf %65, %68 : vector<96x128xf32>
    %70 = vector.extract_strided_slice %69 {offsets = [0, 0], sizes = [32, 128], strides = [1, 1]} : vector<96x128xf32> to vector<32x128xf32>
    %cst_33 = arith.constant 0.000000e+00 : f32
    %71 = vector.broadcast %cst_33 : f32 to vector<32x128xf32>
    %72 = arith.subf %71, %70 : vector<32x128xf32>
    %73 = math.exp %72 : vector<32x128xf32>
    %cst_34 = arith.constant 1.000000e+00 : f32
    %74 = vector.broadcast %cst_34 : f32 to vector<32x128xf32>
    %75 = arith.addf %74, %73 : vector<32x128xf32>
    %76 = tpu.reciprocal %75 {approx = true} : vector<32x128xf32> -> vector<32x128xf32>
    %77 = vector.extract_strided_slice %69 {offsets = [32, 0], sizes = [32, 128], strides = [1, 1]} : vector<96x128xf32> to vector<32x128xf32>
    %cst_35 = arith.constant 0.000000e+00 : f32
    %78 = vector.broadcast %cst_35 : f32 to vector<32x128xf32>
    %79 = arith.cmpf ogt, %77, %78 : vector<32x128xf32>
    %cst_36 = arith.constant 0.000000e+00 : f32
    %80 = vector.broadcast %cst_36 : f32 to vector<32x128xf32>
    %81 = arith.minimumf %77, %80 : vector<32x128xf32>
    %82 = math.exp %81 : vector<32x128xf32>
    %cst_37 = arith.constant 1.000000e+00 : f32
    %83 = vector.broadcast %cst_37 : f32 to vector<32x128xf32>
    %84 = arith.subf %82, %83 : vector<32x128xf32>
    %85 = arith.select %79, %77, %84 : vector<32x128xi1>, vector<32x128xf32>
    %86 = vector.extract_strided_slice %69 {offsets = [64, 0], sizes = [32, 128], strides = [1, 1]} : vector<96x128xf32> to vector<32x128xf32>
    %87 = arith.mulf %76, %85 : vector<32x128xf32>
    %cst_38 = arith.constant 1.000000e+00 : f32
    %88 = vector.broadcast %cst_38 : f32 to vector<32x128xf32>
    %89 = arith.subf %88, %76 : vector<32x128xf32>
    %90 = arith.mulf %89, %86 : vector<32x128xf32>
    %91 = arith.addf %87, %90 : vector<32x128xf32>
    %c0_39 = arith.constant 0 : index
    %c0_40 = arith.constant 0 : index
    %92 = vector.load %arg5[%c0_39, %c0_40] : memref<96x32xbf16, #tpu.memory_space<vmem>>, vector<96x32xbf16>
    %93 = arith.truncf %91 : vector<32x128xf32> to vector<32x128xbf16>
    %cst_41 = arith.constant dense<0.000000e+00> : vector<96x128xf32>
    %94 = tpu.matmul %92, %93, %cst_41 {dimension_numbers = #tpu.dot_dimension_numbers<[1], [0], [0], [1], [0, 0, 1, 1], [], []>} : vector<96x32xbf16>, vector<32x128xbf16>, vector<96x128xf32> -> vector<96x128xf32>
    %c0_42 = arith.constant 0 : index
    %c0_43 = arith.constant 0 : index
    %95 = vector.load %arg6[%c0_42, %c0_43] : memref<96x1xf32, #tpu.memory_space<vmem>>, vector<96x1xf32>
    %96 = vector.broadcast %95 : vector<96x1xf32> to vector<96x128xf32>
    %97 = arith.addf %94, %96 : vector<96x128xf32>
    %cst_44 = arith.constant 0.000000e+00 : f32
    %98 = vector.broadcast %cst_44 : f32 to vector<1x128xf32>
    %c0_45 = arith.constant 0 : index
    %c0_46 = arith.constant 0 : index
    %c0_47 = arith.constant 0 : index
    %99 = vector.load %arg7[%c0_45, %c0_46, %c0_47] : memref<3x32x16xbf16, #tpu.memory_space<vmem>>, vector<1x32x16xbf16>
    %100 = vector.shape_cast %99 : vector<1x32x16xbf16> to vector<32x16xbf16>
    %101 = arith.truncf %0 : vector<16x128xf32> to vector<16x128xbf16>
    %cst_48 = arith.constant dense<0.000000e+00> : vector<32x128xf32>
    %102 = tpu.matmul %100, %101, %cst_48 {dimension_numbers = #tpu.dot_dimension_numbers<[1], [0], [0], [1], [0, 0, 1, 1], [], []>} : vector<32x16xbf16>, vector<16x128xbf16>, vector<32x128xf32> -> vector<32x128xf32>
    %103 = vector.extract_strided_slice %97 {offsets = [0, 0], sizes = [32, 128], strides = [1, 1]} : vector<96x128xf32> to vector<32x128xf32>
    %104 = arith.addf %102, %103 : vector<32x128xf32>
    %cst_49 = arith.constant 0.000000e+00 : f32
    %105 = vector.broadcast %cst_49 : f32 to vector<32x128xf32>
    %106 = arith.cmpf ogt, %104, %105 : vector<32x128xf32>
    %cst_50 = arith.constant 0.000000e+00 : f32
    %107 = vector.broadcast %cst_50 : f32 to vector<32x128xf32>
    %108 = arith.minimumf %104, %107 : vector<32x128xf32>
    %109 = math.exp %108 : vector<32x128xf32>
    %cst_51 = arith.constant 1.000000e+00 : f32
    %110 = vector.broadcast %cst_51 : f32 to vector<32x128xf32>
    %111 = arith.subf %109, %110 : vector<32x128xf32>
    %112 = arith.select %106, %104, %111 : vector<32x128xi1>, vector<32x128xf32>
    %cst_52 = arith.constant 0.000000e+00 : f32
    %113 = vector.broadcast %cst_52 : f32 to vector<32x128xf32>
    %114 = arith.subf %113, %112 : vector<32x128xf32>
    %115 = math.exp %114 : vector<32x128xf32>
    %cst_53 = arith.constant 1.000000e+00 : f32
    %116 = vector.broadcast %cst_53 : f32 to vector<32x128xf32>
    %117 = arith.addf %116, %115 : vector<32x128xf32>
    %118 = tpu.reciprocal %117 {approx = true} : vector<32x128xf32> -> vector<32x128xf32>
    %119 = vector.extract_strided_slice %118 {offsets = [0, 0], sizes = [16, 128], strides = [1, 1]} : vector<32x128xf32> to vector<16x128xf32>
    %120 = vector.extract_strided_slice %118 {offsets = [16, 0], sizes = [16, 128], strides = [1, 1]} : vector<32x128xf32> to vector<16x128xf32>
    %121 = vector.extract_strided_slice %117 {offsets = [16, 0], sizes = [16, 128], strides = [1, 1]} : vector<32x128xf32> to vector<16x128xf32>
    %122 = math.log %121 : vector<16x128xf32>
    %cst_54 = arith.constant 0.000000e+00 : f32
    %123 = vector.broadcast %cst_54 : f32 to vector<16x128xf32>
    %124 = arith.subf %123, %122 : vector<16x128xf32>
    %125 = arith.mulf %120, %0 : vector<16x128xf32>
    %cst_55 = arith.constant 1.000000e+00 : f32
    %126 = vector.broadcast %cst_55 : f32 to vector<16x128xf32>
    %127 = arith.subf %126, %120 : vector<16x128xf32>
    %128 = arith.mulf %127, %119 : vector<16x128xf32>
    %129 = arith.addf %125, %128 : vector<16x128xf32>
    %cst_56 = arith.constant dense<0.000000e+00> : vector<128xf32>
    %130 = vector.multi_reduction <add>, %124, %cst_56 [0] : vector<16x128xf32> to vector<128xf32>
    %131 = vector.shape_cast %130 : vector<128xf32> to vector<1x128xf32>
    %132 = arith.addf %98, %131 : vector<1x128xf32>
    %c1_57 = arith.constant 1 : index
    %c0_58 = arith.constant 0 : index
    %c0_59 = arith.constant 0 : index
    %133 = vector.load %arg7[%c1_57, %c0_58, %c0_59] : memref<3x32x16xbf16, #tpu.memory_space<vmem>>, vector<1x32x16xbf16>
    %134 = vector.shape_cast %133 : vector<1x32x16xbf16> to vector<32x16xbf16>
    %135 = arith.truncf %129 : vector<16x128xf32> to vector<16x128xbf16>
    %cst_60 = arith.constant dense<0.000000e+00> : vector<32x128xf32>
    %136 = tpu.matmul %134, %135, %cst_60 {dimension_numbers = #tpu.dot_dimension_numbers<[1], [0], [0], [1], [0, 0, 1, 1], [], []>} : vector<32x16xbf16>, vector<16x128xbf16>, vector<32x128xf32> -> vector<32x128xf32>
    %137 = vector.extract_strided_slice %97 {offsets = [32, 0], sizes = [32, 128], strides = [1, 1]} : vector<96x128xf32> to vector<32x128xf32>
    %138 = arith.addf %136, %137 : vector<32x128xf32>
    %cst_61 = arith.constant 0.000000e+00 : f32
    %139 = vector.broadcast %cst_61 : f32 to vector<32x128xf32>
    %140 = arith.cmpf ogt, %138, %139 : vector<32x128xf32>
    %cst_62 = arith.constant 0.000000e+00 : f32
    %141 = vector.broadcast %cst_62 : f32 to vector<32x128xf32>
    %142 = arith.minimumf %138, %141 : vector<32x128xf32>
    %143 = math.exp %142 : vector<32x128xf32>
    %cst_63 = arith.constant 1.000000e+00 : f32
    %144 = vector.broadcast %cst_63 : f32 to vector<32x128xf32>
    %145 = arith.subf %143, %144 : vector<32x128xf32>
    %146 = arith.select %140, %138, %145 : vector<32x128xi1>, vector<32x128xf32>
    %cst_64 = arith.constant 0.000000e+00 : f32
    %147 = vector.broadcast %cst_64 : f32 to vector<32x128xf32>
    %148 = arith.subf %147, %146 : vector<32x128xf32>
    %149 = math.exp %148 : vector<32x128xf32>
    %cst_65 = arith.constant 1.000000e+00 : f32
    %150 = vector.broadcast %cst_65 : f32 to vector<32x128xf32>
    %151 = arith.addf %150, %149 : vector<32x128xf32>
    %152 = tpu.reciprocal %151 {approx = true} : vector<32x128xf32> -> vector<32x128xf32>
    %153 = vector.extract_strided_slice %152 {offsets = [0, 0], sizes = [16, 128], strides = [1, 1]} : vector<32x128xf32> to vector<16x128xf32>
    %154 = vector.extract_strided_slice %152 {offsets = [16, 0], sizes = [16, 128], strides = [1, 1]} : vector<32x128xf32> to vector<16x128xf32>
    %155 = vector.extract_strided_slice %151 {offsets = [16, 0], sizes = [16, 128], strides = [1, 1]} : vector<32x128xf32> to vector<16x128xf32>
    %156 = math.log %155 : vector<16x128xf32>
    %cst_66 = arith.constant 0.000000e+00 : f32
    %157 = vector.broadcast %cst_66 : f32 to vector<16x128xf32>
    %158 = arith.subf %157, %156 : vector<16x128xf32>
    %159 = arith.mulf %154, %129 : vector<16x128xf32>
    %cst_67 = arith.constant 1.000000e+00 : f32
    %160 = vector.broadcast %cst_67 : f32 to vector<16x128xf32>
    %161 = arith.subf %160, %154 : vector<16x128xf32>
    %162 = arith.mulf %161, %153 : vector<16x128xf32>
    %163 = arith.addf %159, %162 : vector<16x128xf32>
    %cst_68 = arith.constant dense<0.000000e+00> : vector<128xf32>
    %164 = vector.multi_reduction <add>, %158, %cst_68 [0] : vector<16x128xf32> to vector<128xf32>
    %165 = vector.shape_cast %164 : vector<128xf32> to vector<1x128xf32>
    %166 = arith.addf %132, %165 : vector<1x128xf32>
    %c2_69 = arith.constant 2 : index
    %c0_70 = arith.constant 0 : index
    %c0_71 = arith.constant 0 : index
    %167 = vector.load %arg7[%c2_69, %c0_70, %c0_71] : memref<3x32x16xbf16, #tpu.memory_space<vmem>>, vector<1x32x16xbf16>
    %168 = vector.shape_cast %167 : vector<1x32x16xbf16> to vector<32x16xbf16>
    %169 = arith.truncf %163 : vector<16x128xf32> to vector<16x128xbf16>
    %cst_72 = arith.constant dense<0.000000e+00> : vector<32x128xf32>
    %170 = tpu.matmul %168, %169, %cst_72 {dimension_numbers = #tpu.dot_dimension_numbers<[1], [0], [0], [1], [0, 0, 1, 1], [], []>} : vector<32x16xbf16>, vector<16x128xbf16>, vector<32x128xf32> -> vector<32x128xf32>
    %171 = vector.extract_strided_slice %97 {offsets = [64, 0], sizes = [32, 128], strides = [1, 1]} : vector<96x128xf32> to vector<32x128xf32>
    %172 = arith.addf %170, %171 : vector<32x128xf32>
    %cst_73 = arith.constant 0.000000e+00 : f32
    %173 = vector.broadcast %cst_73 : f32 to vector<32x128xf32>
    %174 = arith.cmpf ogt, %172, %173 : vector<32x128xf32>
    %cst_74 = arith.constant 0.000000e+00 : f32
    %175 = vector.broadcast %cst_74 : f32 to vector<32x128xf32>
    %176 = arith.minimumf %172, %175 : vector<32x128xf32>
    %177 = math.exp %176 : vector<32x128xf32>
    %cst_75 = arith.constant 1.000000e+00 : f32
    %178 = vector.broadcast %cst_75 : f32 to vector<32x128xf32>
    %179 = arith.subf %177, %178 : vector<32x128xf32>
    %180 = arith.select %174, %172, %179 : vector<32x128xi1>, vector<32x128xf32>
    %cst_76 = arith.constant 0.000000e+00 : f32
    %181 = vector.broadcast %cst_76 : f32 to vector<32x128xf32>
    %182 = arith.subf %181, %180 : vector<32x128xf32>
    %183 = math.exp %182 : vector<32x128xf32>
    %cst_77 = arith.constant 1.000000e+00 : f32
    %184 = vector.broadcast %cst_77 : f32 to vector<32x128xf32>
    %185 = arith.addf %184, %183 : vector<32x128xf32>
    %186 = tpu.reciprocal %185 {approx = true} : vector<32x128xf32> -> vector<32x128xf32>
    %187 = vector.extract_strided_slice %186 {offsets = [0, 0], sizes = [16, 128], strides = [1, 1]} : vector<32x128xf32> to vector<16x128xf32>
    %188 = vector.extract_strided_slice %186 {offsets = [16, 0], sizes = [16, 128], strides = [1, 1]} : vector<32x128xf32> to vector<16x128xf32>
    %189 = vector.extract_strided_slice %185 {offsets = [16, 0], sizes = [16, 128], strides = [1, 1]} : vector<32x128xf32> to vector<16x128xf32>
    %190 = math.log %189 : vector<16x128xf32>
    %cst_78 = arith.constant 0.000000e+00 : f32
    %191 = vector.broadcast %cst_78 : f32 to vector<16x128xf32>
    %192 = arith.subf %191, %190 : vector<16x128xf32>
    %193 = arith.mulf %188, %163 : vector<16x128xf32>
    %cst_79 = arith.constant 1.000000e+00 : f32
    %194 = vector.broadcast %cst_79 : f32 to vector<16x128xf32>
    %195 = arith.subf %194, %188 : vector<16x128xf32>
    %196 = arith.mulf %195, %187 : vector<16x128xf32>
    %197 = arith.addf %193, %196 : vector<16x128xf32>
    %cst_80 = arith.constant dense<0.000000e+00> : vector<128xf32>
    %198 = vector.multi_reduction <add>, %192, %cst_80 [0] : vector<16x128xf32> to vector<128xf32>
    %199 = vector.shape_cast %198 : vector<128xf32> to vector<1x128xf32>
    %200 = arith.addf %166, %199 : vector<1x128xf32>
    %c0_81 = arith.constant 0 : index
    %c0_82 = arith.constant 0 : index
    %201 = vector.load %arg8[%c0_81, %c0_82] : memref<16x128xf32, #tpu.memory_space<vmem>>, vector<16x128xf32>
    tpu.vector_store %arg8[%c0_81, %c0_82], %197 {strides = array<i32>} : memref<16x128xf32, #tpu.memory_space<vmem>>, vector<16x128xf32>,
    %202 = vector.shape_cast %200 : vector<1x128xf32> to vector<1x128xf32>
    %203 = vector.broadcast %202 : vector<1x128xf32> to vector<8x128xf32>
    %c0_83 = arith.constant 0 : index
    %c0_84 = arith.constant 0 : index
    %204 = vector.load %arg9[%c0_83, %c0_84] : memref<8x128xf32, #tpu.memory_space<vmem>>, vector<8x128xf32>
    tpu.vector_store %arg9[%c0_83, %c0_84], %203 {strides = array<i32>} : memref<8x128xf32, #tpu.memory_space<vmem>>, vector<8x128xf32>,
    return
  }
  func.func @transform_0(%arg0: i32) -> (i32, i32) {
    %c0_i32 = arith.constant 0 : i32
    %c0_i32_0 = arith.constant 0 : i32
    return %c0_i32, %arg0 : i32, i32
  }
  func.func @transform_1(%arg0: i32) -> (i32, i32) {
    %c0_i32 = arith.constant 0 : i32
    %c0_i32_0 = arith.constant 0 : i32
    return %c0_i32, %arg0 : i32, i32
  }
  func.func @transform_2(%arg0: i32) -> (i32, i32, i32) {
    %c0_i32 = arith.constant 0 : i32
    %c0_i32_0 = arith.constant 0 : i32
    %c0_i32_1 = arith.constant 0 : i32
    %c0_i32_2 = arith.constant 0 : i32
    return %c0_i32, %c0_i32_0, %c0_i32_1 : i32, i32, i32
  }
  func.func @transform_3(%arg0: i32) -> (i32, i32, i32) {
    %c0_i32 = arith.constant 0 : i32
    %c0_i32_0 = arith.constant 0 : i32
    %c0_i32_1 = arith.constant 0 : i32
    %c0_i32_2 = arith.constant 0 : i32
    return %c0_i32, %c0_i32_0, %c0_i32_1 : i32, i32, i32
  }
  func.func @transform_4(%arg0: i32) -> (i32, i32) {
    %c0_i32 = arith.constant 0 : i32
    %c0_i32_0 = arith.constant 0 : i32
    %c0_i32_1 = arith.constant 0 : i32
    return %c0_i32, %c0_i32_0 : i32, i32
  }
  func.func @transform_5(%arg0: i32) -> (i32, i32) {
    %c0_i32 = arith.constant 0 : i32
    %c0_i32_0 = arith.constant 0 : i32
    %c0_i32_1 = arith.constant 0 : i32
    return %c0_i32, %c0_i32_0 : i32, i32
  }
  func.func @transform_6(%arg0: i32) -> (i32, i32, i32) {
    %c0_i32 = arith.constant 0 : i32
    %c0_i32_0 = arith.constant 0 : i32
    %c0_i32_1 = arith.constant 0 : i32
    %c0_i32_2 = arith.constant 0 : i32
    return %c0_i32, %c0_i32_0, %c0_i32_1 : i32, i32, i32
  }
  func.func @transform_7(%arg0: i32) -> (i32, i32) {
    %c0_i32 = arith.constant 0 : i32
    %c0_i32_0 = arith.constant 0 : i32
    return %c0_i32, %arg0 : i32, i32
  }
  func.func @transform_8(%arg0: i32) -> (i32, i32) {
    %c0_i32 = arith.constant 0 : i32
    %c0_i32_0 = arith.constant 0 : i32
    return %c0_i32, %arg0 : i32, i32
  }
}

</mosaic_0001>

<bundles_post_ra>
// kernel: tpu_custom_call.1
= control target key start
LH: loop header
LB: loop body
LE: loop exit
PB: predicated region body
PF: predicated region fallthrough
CT: control target
= control target key end

     0   :  { %14 = vsyncpa [#allocation3], 0  ;;  %v1749_v3 = vmov 0   ;;  %s2199_s0 = inlined_call_operand.vmem [shape: f32[16,128], index: 0, kind: input, shape index: {}]   ;;  %s2200_s1 = inlined_call_operand.vmem [shape: f32[32,128], index: 1, kind: input, shape index: {}]   ;;  %s2201_s2 = inlined_call_operand.vmem [shape: bf16[3,96,32], index: 2, kind: input, shape index: {}]   ;;  %s2202_s3 = inlined_call_operand.vmem [shape: f32[3,96,1], index: 3, kind: input, shape index: {}]   ;;  %s2203_s4 = inlined_call_operand.vmem [shape: bf16[96,32], index: 4, kind: input, shape index: {}]   ;;  %s2204_s5 = inlined_call_operand.vmem [shape: f32[96,1], index: 5, kind: input, shape index: {}]   ;;  %s2205_s6 = inlined_call_operand.vmem [shape: bf16[3,32,16], index: 6, kind: input, shape index: {}]   ;;  %s2206_s7 = inlined_call_operand.hbm [shape: f32[16,128], index: 7, kind: output, shape index: {0}]   ;;  %s2207_s8 = inlined_call_operand.hbm [shape: f32[8,128], index: 8, kind: output, shape index: {1}]  }
   0x1   :  { %v57_v0 = vld [vmem:[%s2202_s3 + $0x30] sm:$0xff]  ;;  %v51_v2 = vld [vmem:[%s2202_s3] sm:$0xff]  ;;  %1540 = vset.pattern.permute.xlu2 %v1749_v3  ;;  %1539 = vset.pattern.permute.xlu1 %v1749_v3  ;;  %v36_v5 = vld [vmem:[%s2200_s1 + $0x18] sm:$0xff] }
   0x2   :  { %v53_v1 = vld [vmem:[%s2202_s3 + $0x10] sm:$0xff]  ;;  %v33_v6 = vld [vmem:[%s2200_s1] sm:$0xff]  ;;  %1538 = vset.pattern.permute.xlu0 %v1749_v3  ;;  %95 = vperm.xlu2 %1540, %v57_v0   ;;  %v34_v8 = vld [vmem:[%s2200_s1 + $0x8] sm:$0xff] }
   0x3   :  { %v35_v4 = vld [vmem:[%s2200_s1 + $0x10] sm:$0xff]  ;;  %75 = vperm.xlu0 %1538, %v53_v1   ;;  %65 = vperm.xlu1 %1539, %v51_v2   ;;  %v49_v9 = vpack.c.bf16 %v34_v8, %v33_v6  ;;  %v58_v10 = vld [vmem:[%s2202_s3 + $0x38] sm:$0xff] }
   0x4   :  { %v50_v7 = vpack.c.bf16 %v36_v5, %v35_v4 }
   0x6   :  { %178 = vmatpush.bf16.msra.mxu0 %v50_v7 }
   0x7   :  { %15 = vsyncpa [#allocation5], 0  ;;  %v54_v11 = vld [vmem:[%s2202_s3 + $0x18] sm:$0xff]  ;;  %v52_v12 = vld [vmem:[%s2202_s3 + $0x8] sm:$0xff]  ;;  %vm153_vm0 = vcmask 261120   ;;  %vm929_vm9 = vcmask 130048  }
   0x8   :  { %v1502_v13 = vld [vmem:[%s2201_s2] sm:$0xff]  ;;  %v61_v14 = vld [vmem:[%s2202_s3 + $0x50] sm:$0xff]  ;;  %v56_v16 = vld [vmem:[%s2202_s3 + $0x28] sm:$0xff]  ;;  %s1244_s27 = sshll.u32 %s2206_s7, 4  ;;  %s1751_s28 = smov 128   ;;  %s1245_s27 = int_to_ptr.hbm [resolvable:$true] %s1244_s27 }
   0x9   :  { %v55_v15 = vld [vmem:[%s2202_s3 + $0x20] sm:$0xff]  ;;  %v60_v17 = vld [vmem:[%s2202_s3 + $0x48] sm:$0xff]  ;;  %v62_v18 = vld [vmem:[%s2202_s3 + $0x58] sm:$0xff]  ;;  %s1752_s29 = smov 8   ;;  %s1753_s7 = smov [#allocation4]  }
   0xa   :  { %179 = vmatpush.bf16.msra.mxu0 %v49_v9  ;;  %100 = vperm.xlu2 %1540, %v58_v10   ;;  %v59_v19 = vld [vmem:[%s2202_s3 + $0x40] sm:$0xff]  ;;  %v1503_v20 = vld [vmem:[%s2201_s2 + $0x8] sm:$0xff]  ;;  %v1320_v22 = vld [vmem:[%s2202_s3 + $0x70] sm:$0xff]  ;;  %s1258_s10 = sshll.u32 %s2207_s8, 4  ;;  %s1259_s10 = int_to_ptr.hbm [resolvable:$true] %s1258_s10 }
   0xb   :  { %80 = vperm.xlu0 %1538, %v54_v11   ;;  %70 = vperm.xlu1 %1539, %v52_v12   ;;  %v1318_v21 = vld [vmem:[%s2202_s3 + $0x60] sm:$0xff]  ;;  %v1321_v23 = vld [vmem:[%s2202_s3 + $0x78] sm:$0xff]  ;;  %v1319_v25 = vld [vmem:[%s2202_s3 + $0x68] sm:$0xff] }
   0xc   :  { %v1325_v24 = vld [vmem:[%s2202_s3 + $0x98] sm:$0xff]  ;;  %v1324_v26 = vld [vmem:[%s2202_s3 + $0x90] sm:$0xff]  ;;  %v1322_v29 = vld [vmem:[%s2202_s3 + $0x80] sm:$0xff] }
   0xd   :  { %1296 = vmatmul.msk.bf16.vlgmr.msra.gmra.mxu0 %vm153_vm0, %v1502_v13  ;;  %v1504_v27 = vld [vmem:[%s2201_s2 + $0x10] sm:$0xff]  ;;  %v1323_v30 = vld [vmem:[%s2202_s3 + $0x88] sm:$0xff]  ;;  %v1329_v32 = vld [vmem:[%s2202_s3 + $0xb8] sm:$0xff] }
   0xe   :  { %v1328_v28 = vld [vmem:[%s2202_s3 + $0xb0] sm:$0xff]  ;;  %v1327_v31 = vld [vmem:[%s2202_s3 + $0xa8] sm:$0xff]  ;;  %v1326_v33 = vld [vmem:[%s2202_s3 + $0xa0] sm:$0xff] }
   0xf   :  { %v1505_v34 = vld [vmem:[%s2201_s2 + $0x18] sm:$0xff]  ;;  %v1376_v35 = vld [vmem:[%s2202_s3 + $0xc0] sm:$0xff]  ;;  %v1378_v36 = vld [vmem:[%s2202_s3 + $0xd0] sm:$0xff] }
  0x10   :  { %v1379_v37 = vld [vmem:[%s2202_s3 + $0xd8] sm:$0xff]  ;;  %v1377_v39 = vld [vmem:[%s2202_s3 + $0xc8] sm:$0xff]  ;;  %v1382_v40 = vld [vmem:[%s2202_s3 + $0xf0] sm:$0xff] }
  0x11   :  { %v1383_v38 = vld [vmem:[%s2202_s3 + $0xf8] sm:$0xff]  ;;  %v1506_v41 = vld [vmem:[%s2201_s2 + $0x20] sm:$0xff]  ;;  %v1386_v42 = vld [vmem:[%s2202_s3 + $0x110] sm:$0xff] }
  0x12   :  { %115 = vperm.xlu2 %1540, %v61_v14   ;;  %v1380_v43 = vld [vmem:[%s2202_s3 + $0xe0] sm:$0xff]  ;;  %v1381_v44 = vld [vmem:[%s2202_s3 + $0xe8] sm:$0xff]  ;;  %v1387_v46 = vld [vmem:[%s2202_s3 + $0x118] sm:$0xff] }
  0x13   :  { %85 = vperm.xlu0 %1538, %v55_v15   ;;  %90 = vperm.xlu1 %1539, %v56_v16   ;;  %v1385_v45 = vld [vmem:[%s2202_s3 + $0x108] sm:$0xff]  ;;  %v1384_v47 = vld [vmem:[%s2202_s3 + $0x100] sm:$0xff]  ;;  %v757_v50 = vld [vmem:[%s2204_s5 + $0x10] sm:$0xff] }
  0x14   :  { %v1507_v48 = vld [vmem:[%s2201_s2 + $0x28] sm:$0xff]  ;;  %v755_v49 = vld [vmem:[%s2204_s5] sm:$0xff]  ;;  %v758_v51 = vld [vmem:[%s2204_s5 + $0x18] sm:$0xff] }
  0x15   :  { %v762_v52 = vld [vmem:[%s2204_s5 + $0x38] sm:$0xff]  ;;  %v756_v53 = vld [vmem:[%s2204_s5 + $0x8] sm:$0xff]  ;;  %v761_v54 = vld [vmem:[%s2204_s5 + $0x30] sm:$0xff] }
  0x16   :  { %v765_v55 = vld [vmem:[%s2204_s5 + $0x50] sm:$0xff]  ;;  %v759_v56 = vld [vmem:[%s2204_s5 + $0x20] sm:$0xff]  ;;  %v760_v57 = vld [vmem:[%s2204_s5 + $0x28] sm:$0xff] }
  0x17   :  { %v764_v58 = vld [vmem:[%s2204_s5 + $0x48] sm:$0xff]  ;;  %v766_v59 = vld [vmem:[%s2204_s5 + $0x58] sm:$0xff]  ;;  %v763_v60 = vld [vmem:[%s2204_s5 + $0x40] sm:$0xff] }
  0x1a   :  { %110 = vperm.xlu2 %1540, %v60_v17  }
  0x1b   :  { %120 = vperm.xlu0 %1538, %v62_v18   ;;  %105 = vperm.xlu1 %1539, %v59_v19  }
  0x1d   :  { %1297 = vmatmul.msk.bf16.gmra.mxu0 %vm153_vm0, %v1503_v20 }
  0x22   :  { %301 = vperm.xlu2 %1540, %v1318_v21  }
  0x23   :  { %311 = vperm.xlu0 %1538, %v1320_v22   ;;  %316 = vperm.xlu1 %1539, %v1321_v23  }
  0x2a   :  { %336 = vperm.xlu2 %1540, %v1325_v24  }
  0x2b   :  { %306 = vperm.xlu0 %1538, %v1319_v25   ;;  %331 = vperm.xlu1 %1539, %v1324_v26  }
  0x2d   :  { %1298 = vmatmul.msk.bf16.gmra.mxu0 %vm153_vm0, %v1504_v27 }
  0x32   :  { %351 = vperm.xlu2 %1540, %v1328_v28  }
  0x33   :  { %321 = vperm.xlu0 %1538, %v1322_v29   ;;  %326 = vperm.xlu1 %1539, %v1323_v30  }
  0x3a   :  { %346 = vperm.xlu2 %1540, %v1327_v31  }
  0x3b   :  { %356 = vperm.xlu0 %1538, %v1329_v32   ;;  %341 = vperm.xlu1 %1539, %v1326_v33  }
  0x3d   :  { %1299 = vmatmul.msk.bf16.gmra.mxu0 %vm153_vm0, %v1505_v34 }
  0x42   :  { %536 = vperm.xlu2 %1540, %v1376_v35  }
  0x43   :  { %546 = vperm.xlu0 %1538, %v1378_v36   ;;  %551 = vperm.xlu1 %1539, %v1379_v37  }
  0x4a   :  { %571 = vperm.xlu2 %1540, %v1383_v38  }
  0x4b   :  { %541 = vperm.xlu0 %1538, %v1377_v39   ;;  %566 = vperm.xlu1 %1539, %v1382_v40  }
  0x4d   :  { %1300 = vmatmul.msk.bf16.gmra.mxu0 %vm153_vm0, %v1506_v41 }
  0x52   :  { %586 = vperm.xlu2 %1540, %v1386_v42  }
  0x53   :  { %556 = vperm.xlu0 %1538, %v1380_v43   ;;  %561 = vperm.xlu1 %1539, %v1381_v44  }
  0x5a   :  { %581 = vperm.xlu2 %1540, %v1385_v45  }
  0x5b   :  { %591 = vperm.xlu0 %1538, %v1387_v46   ;;  %576 = vperm.xlu1 %1539, %v1384_v47  }
  0x5c   :  { %v96_v8 = vpop.permute.xlu2 %95 }
  0x5d   :  { %1301 = vmatmul.msk.bf16.gmra.mxu0 %vm153_vm0, %v1507_v48 }
  0x62   :  { %769 = vperm.xlu2 %1540, %v755_v49  }
  0x63   :  { %779 = vperm.xlu0 %1538, %v757_v50   ;;  %784 = vperm.xlu1 %1539, %v758_v51  }
  0x64   :  { %v101_v20 = vpop.permute.xlu2 %100 }
  0x6a   :  { %804 = vperm.xlu2 %1540, %v762_v52  }
  0x6b   :  { %774 = vperm.xlu0 %1538, %v756_v53   ;;  %799 = vperm.xlu1 %1539, %v761_v54  }
  0x6c   :  { %v116_v45 = vpop.permute.xlu2 %115 }
  0x72   :  { %819 = vperm.xlu2 %1540, %v765_v55  }
  0x73   :  { %789 = vperm.xlu0 %1538, %v759_v56   ;;  %794 = vperm.xlu1 %1539, %v760_v57  }
  0x75   :  { %v66_v2 = vpop.permute.xlu1 %65  ;;  %v76_v4 = vpop.permute.xlu0 %75 }
  0x7a   :  { %814 = vperm.xlu2 %1540, %v764_v58  }
  0x7b   :  { %824 = vperm.xlu0 %1538, %v766_v59   ;;  %809 = vperm.xlu1 %1539, %v763_v60   ;;  %v111_v59 = vpop.permute.xlu2 %110 }
  0x7d   :  { %v71_v6 = vpop.permute.xlu1 %70  ;;  %v81_v10 = vpop.permute.xlu0 %80 }
  0x85   :  { %v91_v24 = vpop.permute.xlu1 %90  ;;  %v86_v28 = vpop.permute.xlu0 %85 }
  0x8a   :  { %v181_v61 = vpop.f32.mrf.mxu0 }
  0x8b   :  { %v182_v13 = vadd.f32 %v181_v61, %v66_v2 }
  0x8d   :  { %v211_v18 = vsub.f32 0.0, %v182_v13  ;;  %v106_v2 = vpop.permute.xlu1 %105 }
  0x8f   :  { %v215_v25 = vmul.f32 1.442695, %v211_v18 }
  0x92   :  { %v183_v62 = vpop.f32.mrf.mxu0 }
  0x93   :  { %v184_v7 = vadd.f32 %v183_v62, %v71_v6 }
  0x95   :  { %v212_v11 = vsub.f32 0.0, %v184_v7 }
  0x97   :  { %v217_v16 = vmul.f32 1.442695, %v212_v11 }
  0x99   :  { %1541 = vpow2.f32 %v217_v16 }
  0x9a   :  { %v186_v63 = vpop.f32.mrf.mxu0 }
  0x9b   :  { %v187_v9 = vadd.f32 %v186_v63, %v76_v4  ;;  %v121_v63 = vpop.permute.xlu0 %120 }
  0x9d   :  { %v213_v15 = vsub.f32 0.0, %v187_v9 }
  0x9f   :  { %v219_v19 = vmul.f32 1.442695, %v213_v15  ;;  %v1542_v32 = vpop.eup %1541 }
  0xa0   :  { %v224_v38 = vadd.f32 1.0, %v1542_v32  ;;  %v1513_v32 = vld [vmem:[%s2201_s2 + $0x58] sm:$0xff] }
  0xa1   :  { %1543 = vpow2.f32 %v219_v19 }
  0xa2   :  { %v188_v0 = vpop.f32.mrf.mxu0 }
  0xa3   :  { %v189_v12 = vadd.f32 %v188_v0, %v81_v10 }
  0xa5   :  { %v214_v17 = vsub.f32 0.0, %v189_v12 }
  0xa7   :  { %v221_v22 = vmul.f32 1.442695, %v214_v17  ;;  %v1544_v35 = vpop.eup %1543 }
  0xa8   :  { %v225_v43 = vadd.f32 1.0, %v1544_v35 }
  0xa9   :  { %1545 = vpow2.f32 %v221_v22 }
  0xaa   :  { %v191_v1 = vpop.f32.mrf.mxu0  ;;  %1547 = vpow2.f32 %v215_v25 }
  0xab   :  { %v1984_v30 = vadd.f32 %v191_v1, %v86_v28  ;;  %v1509_v28 = vld [vmem:[%s2201_s2 + $0x38] sm:$0xff] }
  0xad   :  { %v235_v36 = vmin.f32 %v1984_v30, 0.0  ;;  %vm231_vm4 = vcmp.gt.f32.partialorder %v1984_v30, 0.0 }
  0xaf   :  { %v1546_v40 = vpop.eup %1545  ;;  %v239_v44 = vmul.f32 1.442695, %v235_v36 }
  0xb0   :  { %v1548_v42 = vpop.eup %1547  ;;  %v226_v46 = vadd.f32 1.0, %v1546_v40  ;;  %v317_v40 = vpop.permute.xlu1 %316 }
  0xb1   :  { %v223_v47 = vadd.f32 1.0, %v1548_v42 }
  0xb2   :  { %v193_v3 = vpop.f32.mrf.mxu0 }
  0xb3   :  { %v1981_v27 = vadd.f32 %v193_v3, %v91_v24 }
  0xb5   :  { %v236_v33 = vmin.f32 %v1981_v27, 0.0  ;;  %vm232_vm3 = vcmp.gt.f32.partialorder %v1981_v27, 0.0 }
  0xb7   :  { %v241_v41 = vmul.f32 1.442695, %v236_v33 }
  0xba   :  { %v196_v5 = vpop.f32.mrf.mxu0 }
  0xbb   :  { %v1979_v21 = vadd.f32 %v196_v5, %v96_v8 }
  0xbd   :  { %v237_v29 = vmin.f32 %v1979_v21, 0.0  ;;  %vm233_vm1 = vcmp.gt.f32.partialorder %v1979_v21, 0.0 }
  0xbf   :  { %v243_v34 = vmul.f32 1.442695, %v237_v29  ;;  %v1510_v29 = vld [vmem:[%s2201_s2 + $0x40] sm:$0xff] }
  0xc1   :  { %1549 = vpow2.f32 %v243_v34 }
  0xc2   :  { %v198_v14 = vpop.f32.mrf.mxu0 }
  0xc3   :  { %v199_v23 = vadd.f32 %v198_v14, %v101_v20 }
  0xc5   :  { %v238_v31 = vmin.f32 %v199_v23, 0.0  ;;  %vm234_vm2 = vcmp.gt.f32.partialorder %v199_v23, 0.0 }
  0xc7   :  { %v245_v37 = vmul.f32 1.442695, %v238_v31  ;;  %v1550_v48 = vpop.eup %1549  ;;  %v1512_v31 = vld [vmem:[%s2201_s2 + $0x50] sm:$0xff] }
  0xc8   :  { %v1304_v54 = vadd.f32 -1.0, %v1550_v48 }
  0xc9   :  { %1551 = vpow2.f32 %v245_v37 }
  0xca   :  { %v201_v26 = vpop.f32.mrf.mxu0  ;;  %1553 = vrcp.f32 %v224_v38  ;;  %v253_v5 = vsel %vm233_vm1, %v1979_v21, %v1304_v54  ;;  %v312_v38 = vpop.permute.xlu0 %311 }
  0xcb   :  { %1555 = vpow2.f32 %v241_v41  ;;  %v202_v7 = vadd.f32 %v201_v26, %v106_v2 }
  0xcc   :  { %1557 = vrcp.f32 %v225_v43 }
  0xcd   :  { %1559 = vpow2.f32 %v239_v44  ;;  %v302_v44 = vpop.permute.xlu2 %301 }
  0xce   :  { %1561 = vrcp.f32 %v226_v46  ;;  %v332_v46 = vpop.permute.xlu1 %331 }
  0xcf   :  { %v1552_v50 = vpop.eup %1551  ;;  %1563 = vrcp.f32 %v223_v47 }
  0xd0   :  { %v1554_v51 = vpop.eup %1553  ;;  %v1305_v55 = vadd.f32 -1.0, %v1552_v50 }
  0xd1   :  { %v1556_v52 = vpop.eup %1555  ;;  %v260_v61 = vsub.f32 1.0, %v1554_v51 }
  0xd2   :  { %v203_v39 = vpop.f32.mrf.mxu0  ;;  %v1558_v53 = vpop.eup %1557  ;;  %v1303_v60 = vadd.f32 -1.0, %v1556_v52  ;;  %v254_v6 = vsel %vm234_vm2, %v199_v23, %v1305_v55 }
  0xd3   :  { %v1560_v56 = vpop.eup %1559  ;;  %v204_v0 = vadd.f32 %v203_v39, %v111_v59  ;;  %v261_v1 = vsub.f32 1.0, %v1558_v53  ;;  %v257_v15 = vmul.f32 %v1558_v53, %v253_v5  ;;  %v307_v42 = vpop.permute.xlu0 %306 }
  0xd4   :  { %v1562_v58 = vpop.eup %1561  ;;  %v1302_v3 = vadd.f32 -1.0, %v1560_v56  ;;  %v252_v11 = vsel %vm232_vm3, %v1981_v27, %v1303_v60  ;;  %v1508_v27 = vld [vmem:[%s2201_s2 + $0x30] sm:$0xff] }
  0xd5   :  { %v1564_v62 = vpop.eup %1563  ;;  %v262_v10 = vsub.f32 1.0, %v1562_v58  ;;  %v264_v13 = vmul.f32 %v260_v61, %v204_v0  ;;  %v258_v16 = vmul.f32 %v1562_v58, %v254_v6  ;;  %v256_v21 = vmul.f32 %v1554_v51, %v252_v11  ;;  %v337_v56 = vpop.permute.xlu2 %336 }
  0xd6   :  { %v259_v12 = vsub.f32 1.0, %v1564_v62  ;;  %v251_v17 = vsel %vm231_vm4, %v1984_v30, %v1302_v3  ;;  %v1511_v30 = vld [vmem:[%s2201_s2 + $0x48] sm:$0xff]  ;;  %v327_v60 = vpop.permute.xlu1 %326 }
  0xd7   :  { %v255_v23 = vmul.f32 %v1564_v62, %v251_v17  ;;  %v268_v24 = vadd.f32 %v264_v13, %v256_v21 }
  0xd8   :  { %v263_v18 = vmul.f32 %v259_v12, %v202_v7 }
  0xda   :  { %v206_v49 = vpop.f32.mrf.mxu0  ;;  %v267_v25 = vadd.f32 %v263_v18, %v255_v23 }
  0xdb   :  { %v207_v57 = vadd.f32 %v206_v49, %v116_v45  ;;  %v322_v0 = vpop.permute.xlu0 %321 }
  0xdc   :  { %v284_v26 = vpack.c.bf16 %v268_v24, %v267_v25 }
  0xdd   :  { %v265_v8 = vmul.f32 %v261_v1, %v207_v57  ;;  %v352_v17 = vpop.permute.xlu2 %351 }
  0xdf   :  { %v269_v19 = vadd.f32 %v265_v8, %v257_v15 }
  0xe2   :  { %v208_v4 = vpop.f32.mrf.mxu0 }
  0xe3   :  { %v209_v9 = vadd.f32 %v208_v4, %v121_v63 }
  0xe5   :  { %v266_v14 = vmul.f32 %v262_v10, %v209_v9 }
  0xe7   :  { %v270_v20 = vadd.f32 %v266_v14, %v258_v16 }
  0xe9   :  { %v285_v22 = vpack.c.bf16 %v270_v20, %v269_v19 }
  0xeb   :  { %413 = vmatpush.bf16.msra.mxu1 %v285_v22 }
  0xef   :  { %414 = vmatpush.bf16.msra.mxu1 %v284_v26 }
  0xf2   :  { %1354 = vmatmul.msk.bf16.vlgmr.msra.gmra.mxu1 %vm153_vm0, %v1508_v27 }
 0x102   :  { %1355 = vmatmul.msk.bf16.gmra.mxu1 %vm153_vm0, %v1509_v28 }
 0x112   :  { %1356 = vmatmul.msk.bf16.gmra.mxu1 %vm153_vm0, %v1510_v29 }
 0x122   :  { %1357 = vmatmul.msk.bf16.gmra.mxu1 %vm153_vm0, %v1511_v30 }
 0x132   :  { %1358 = vmatmul.msk.bf16.gmra.mxu1 %vm153_vm0, %v1512_v31  ;;  %v347_v31 = vpop.permute.xlu2 %346 }
 0x142   :  { %1359 = vmatmul.msk.bf16.gmra.mxu1 %vm153_vm0, %v1513_v32 }
 0x16f   :  { %v416_v33 = vpop.f32.mrf.mxu1 }
 0x170   :  { %v417_v49 = vadd.f32 %v416_v33, %v302_v44 }
 0x172   :  { %v446_v54 = vsub.f32 0.0, %v417_v49 }
 0x174   :  { %v450_v61 = vmul.f32 1.442695, %v446_v54 }
 0x177   :  { %v418_v34 = vpop.f32.mrf.mxu1 }
 0x178   :  { %v419_v43 = vadd.f32 %v418_v34, %v307_v42 }
 0x17a   :  { %v447_v47 = vsub.f32 0.0, %v419_v43 }
 0x17c   :  { %v452_v52 = vmul.f32 1.442695, %v447_v47 }
 0x17e   :  { %1565 = vpow2.f32 %v452_v52 }
 0x17f   :  { %v421_v35 = vpop.f32.mrf.mxu1 }
 0x180   :  { %v422_v45 = vadd.f32 %v421_v35, %v312_v38  ;;  %v357_v35 = vpop.permute.xlu0 %356  ;;  %v342_v38 = vpop.permute.xlu1 %341 }
 0x182   :  { %v448_v51 = vsub.f32 0.0, %v422_v45 }
 0x184   :  { %v454_v55 = vmul.f32 1.442695, %v448_v51  ;;  %v1566_v4 = vpop.eup %1565 }
 0x185   :  { %v459_v10 = vadd.f32 1.0, %v1566_v4  ;;  %v1519_v4 = vld [vmem:[%s2201_s2 + $0x88] sm:$0xff] }
 0x186   :  { %1567 = vpow2.f32 %v454_v55 }
 0x187   :  { %v423_v36 = vpop.f32.mrf.mxu1 }
 0x188   :  { %v424_v48 = vadd.f32 %v423_v36, %v317_v40 }
 0x18a   :  { %v449_v53 = vsub.f32 0.0, %v424_v48 }
 0x18c   :  { %v456_v58 = vmul.f32 1.442695, %v449_v53  ;;  %v1568_v7 = vpop.eup %1567 }
 0x18d   :  { %v460_v15 = vadd.f32 1.0, %v1568_v7 }
 0x18e   :  { %1569 = vpow2.f32 %v456_v58 }
 0x18f   :  { %v426_v37 = vpop.f32.mrf.mxu1  ;;  %1571 = vpow2.f32 %v450_v61 }
 0x190   :  { %v2023_v2 = vadd.f32 %v426_v37, %v322_v0  ;;  %v1515_v0 = vld [vmem:[%s2201_s2 + $0x68] sm:$0xff] }
 0x192   :  { %v470_v8 = vmin.f32 %v2023_v2, 0.0  ;;  %vm466_vm8 = vcmp.gt.f32.partialorder %v2023_v2, 0.0 }
 0x194   :  { %v1570_v12 = vpop.eup %1569  ;;  %v474_v16 = vmul.f32 1.442695, %v470_v8 }
 0x195   :  { %v1572_v14 = vpop.eup %1571  ;;  %v461_v18 = vadd.f32 1.0, %v1570_v12  ;;  %v552_v12 = vpop.permute.xlu1 %551 }
 0x196   :  { %v458_v19 = vadd.f32 1.0, %v1572_v14 }
 0x197   :  { %v428_v39 = vpop.f32.mrf.mxu1 }
 0x198   :  { %v2020_v63 = vadd.f32 %v428_v39, %v327_v60 }
 0x19a   :  { %v471_v5 = vmin.f32 %v2020_v63, 0.0  ;;  %vm467_vm7 = vcmp.gt.f32.partialorder %v2020_v63, 0.0 }
 0x19c   :  { %v476_v13 = vmul.f32 1.442695, %v471_v5 }
 0x19f   :  { %v431_v41 = vpop.f32.mrf.mxu1 }
 0x1a0   :  { %v2018_v57 = vadd.f32 %v431_v41, %v332_v46 }
 0x1a2   :  { %v472_v1 = vmin.f32 %v2018_v57, 0.0  ;;  %vm468_vm5 = vcmp.gt.f32.partialorder %v2018_v57, 0.0 }
 0x1a4   :  { %v478_v6 = vmul.f32 1.442695, %v472_v1  ;;  %v1516_v1 = vld [vmem:[%s2201_s2 + $0x70] sm:$0xff] }
 0x1a6   :  { %1573 = vpow2.f32 %v478_v6 }
 0x1a7   :  { %v433_v50 = vpop.f32.mrf.mxu1 }
 0x1a8   :  { %v434_v59 = vadd.f32 %v433_v50, %v337_v56 }
 0x1aa   :  { %v473_v3 = vmin.f32 %v434_v59, 0.0  ;;  %vm469_vm6 = vcmp.gt.f32.partialorder %v434_v59, 0.0 }
 0x1ac   :  { %v480_v9 = vmul.f32 1.442695, %v473_v3  ;;  %v1574_v20 = vpop.eup %1573  ;;  %v1518_v3 = vld [vmem:[%s2201_s2 + $0x80] sm:$0xff] }
 0x1ad   :  { %v1362_v26 = vadd.f32 -1.0, %v1574_v20 }
 0x1ae   :  { %1575 = vpow2.f32 %v480_v9 }
 0x1af   :  { %v436_v62 = vpop.f32.mrf.mxu1  ;;  %1577 = vrcp.f32 %v459_v10  ;;  %v488_v41 = vsel %vm468_vm5, %v2018_v57, %v1362_v26  ;;  %v547_v10 = vpop.permute.xlu0 %546 }
 0x1b0   :  { %1579 = vpow2.f32 %v476_v13  ;;  %v437_v43 = vadd.f32 %v436_v62, %v342_v38 }
 0x1b1   :  { %1581 = vrcp.f32 %v460_v15 }
 0x1b2   :  { %1583 = vpow2.f32 %v474_v16  ;;  %v537_v16 = vpop.permute.xlu2 %536 }
 0x1b3   :  { %1585 = vrcp.f32 %v461_v18  ;;  %v567_v18 = vpop.permute.xlu1 %566 }
 0x1b4   :  { %v1576_v22 = vpop.eup %1575  ;;  %1587 = vrcp.f32 %v458_v19 }
 0x1b5   :  { %v1578_v23 = vpop.eup %1577  ;;  %v1363_v27 = vadd.f32 -1.0, %v1576_v22 }
 0x1b6   :  { %v1580_v24 = vpop.eup %1579  ;;  %v495_v33 = vsub.f32 1.0, %v1578_v23 }
 0x1b7   :  { %v438_v11 = vpop.f32.mrf.mxu1  ;;  %v1582_v25 = vpop.eup %1581  ;;  %v1361_v32 = vadd.f32 -1.0, %v1580_v24  ;;  %v489_v42 = vsel %vm469_vm6, %v434_v59, %v1363_v27 }
 0x1b8   :  { %v1584_v28 = vpop.eup %1583  ;;  %v439_v36 = vadd.f32 %v438_v11, %v347_v31  ;;  %v496_v37 = vsub.f32 1.0, %v1582_v25  ;;  %v492_v51 = vmul.f32 %v1582_v25, %v488_v41  ;;  %v542_v14 = vpop.permute.xlu0 %541 }
 0x1b9   :  { %v1586_v30 = vpop.eup %1585  ;;  %v1360_v39 = vadd.f32 -1.0, %v1584_v28  ;;  %v487_v47 = vsel %vm467_vm7, %v2020_v63, %v1361_v32  ;;  %v1514_v63 = vld [vmem:[%s2201_s2 + $0x60] sm:$0xff] }
 0x1ba   :  { %v1588_v34 = vpop.eup %1587  ;;  %v497_v46 = vsub.f32 1.0, %v1586_v30  ;;  %v499_v49 = vmul.f32 %v495_v33, %v439_v36  ;;  %v493_v52 = vmul.f32 %v1586_v30, %v489_v42  ;;  %v491_v57 = vmul.f32 %v1578_v23, %v487_v47  ;;  %v572_v28 = vpop.permute.xlu2 %571 }
 0x1bb   :  { %v494_v48 = vsub.f32 1.0, %v1588_v34  ;;  %v486_v53 = vsel %vm466_vm8, %v2023_v2, %v1360_v39  ;;  %v1517_v2 = vld [vmem:[%s2201_s2 + $0x78] sm:$0xff]  ;;  %v562_v32 = vpop.permute.xlu1 %561 }
 0x1bc   :  { %v490_v59 = vmul.f32 %v1588_v34, %v486_v53  ;;  %v503_v60 = vadd.f32 %v499_v49, %v491_v57  ;;  %v2079_v49 = vld [vmem:[%s2199_s0 + $0x8] sm:$0xff] }
 0x1bd   :  { %v498_v54 = vmul.f32 %v494_v48, %v437_v43  ;;  %v2074_v48 = vld [vmem:[%s2199_s0] sm:$0xff]  ;;  %s1256_s0 = sshll.u32 %s1753_s7, 4  ;;  %s1257_s0 = int_to_ptr.vmem [resolvable:$true] %s1256_s0 }
 0x1bf   :  { %v441_v21 = vpop.f32.mrf.mxu1  ;;  %v502_v61 = vadd.f32 %v498_v54, %v490_v59 }
 0x1c0   :  { %v442_v29 = vadd.f32 %v441_v21, %v352_v17  ;;  %v557_v36 = vpop.permute.xlu0 %556 }
 0x1c1   :  { %v519_v62 = vpack.c.bf16 %v503_v60, %v502_v61 }
 0x1c2   :  { %v500_v44 = vmul.f32 %v496_v37, %v442_v29  ;;  %v587_v57 = vpop.permute.xlu2 %586 }
 0x1c4   :  { %v504_v55 = vadd.f32 %v500_v44, %v492_v51 }
 0x1c7   :  { %v443_v40 = vpop.f32.mrf.mxu1 }
 0x1c8   :  { %v444_v45 = vadd.f32 %v443_v40, %v357_v35 }
 0x1ca   :  { %v501_v50 = vmul.f32 %v497_v46, %v444_v45 }
 0x1cc   :  { %v505_v56 = vadd.f32 %v501_v50, %v493_v52  ;;  %v2083_v52 = vpack.c.bf16 %v2079_v49, %v2074_v48 }
 0x1ce   :  { %v520_v58 = vpack.c.bf16 %v505_v56, %v504_v55  ;;  %v1526_v55 = vld [vmem:[%s2205_s6] sm:$0xff]  ;;  %943 = vmatpush.bf16.msrb.mxu0 %v2083_v52 }
 0x1d0   :  { %648 = vmatpush.bf16.msra.mxu2 %v520_v58 }
 0x1d1   :  { %1460 = vmatmul.msk.bf16.vlgmr.msrb.gmra.mxu0 %vm929_vm9, %v1526_v55 }
 0x1d4   :  { %649 = vmatpush.bf16.msra.mxu2 %v519_v62 }
 0x1d7   :  { %1412 = vmatmul.msk.bf16.vlgmr.msra.gmra.mxu2 %vm153_vm0, %v1514_v63 }
 0x1e7   :  { %1413 = vmatmul.msk.bf16.gmra.mxu2 %vm153_vm0, %v1515_v0 }
 0x1f7   :  { %1414 = vmatmul.msk.bf16.gmra.mxu2 %vm153_vm0, %v1516_v1 }
 0x207   :  { %1415 = vmatmul.msk.bf16.gmra.mxu2 %vm153_vm0, %v1517_v2 }
 0x217   :  { %1416 = vmatmul.msk.bf16.gmra.mxu2 %vm153_vm0, %v1518_v3 }
 0x227   :  { %1417 = vmatmul.msk.bf16.gmra.mxu2 %vm153_vm0, %v1519_v4 }
 0x25a   :  { %v651_v5 = vpop.f32.mrf.mxu2 }
 0x25b   :  { %v652_v21 = vadd.f32 %v651_v5, %v537_v16 }
 0x25d   :  { %v681_v26 = vsub.f32 0.0, %v652_v21 }
 0x25f   :  { %v685_v33 = vmul.f32 1.442695, %v681_v26 }
 0x262   :  { %v653_v6 = vpop.f32.mrf.mxu2 }
 0x263   :  { %v654_v15 = vadd.f32 %v653_v6, %v542_v14  ;;  %v577_v14 = vpop.permute.xlu1 %576 }
 0x265   :  { %v682_v19 = vsub.f32 0.0, %v654_v15 }
 0x267   :  { %v687_v24 = vmul.f32 1.442695, %v682_v19 }
 0x269   :  { %1589 = vpow2.f32 %v687_v24 }
 0x26a   :  { %v656_v7 = vpop.f32.mrf.mxu2 }
 0x26b   :  { %v657_v17 = vadd.f32 %v656_v7, %v547_v10  ;;  %v582_v7 = vpop.permute.xlu2 %581 }
 0x26d   :  { %v683_v23 = vsub.f32 0.0, %v657_v17 }
 0x26f   :  { %v689_v27 = vmul.f32 1.442695, %v683_v23  ;;  %v1590_v40 = vpop.eup %1589 }
 0x270   :  { %v694_v46 = vadd.f32 1.0, %v1590_v40 }
 0x271   :  { %1591 = vpow2.f32 %v689_v27 }
 0x272   :  { %v658_v8 = vpop.f32.mrf.mxu2 }
 0x273   :  { %v659_v20 = vadd.f32 %v658_v8, %v552_v12 }
 0x275   :  { %v684_v25 = vsub.f32 0.0, %v659_v20 }
 0x277   :  { %v691_v30 = vmul.f32 1.442695, %v684_v25  ;;  %v1592_v43 = vpop.eup %1591 }
 0x278   :  { %v695_v54 = vadd.f32 1.0, %v1592_v43  ;;  %v1524_v43 = vld [vmem:[%s2203_s4 + $0x20] sm:$0xff] }
 0x279   :  { %1593 = vpow2.f32 %v691_v30 }
 0x27a   :  { %v661_v9 = vpop.f32.mrf.mxu2  ;;  %1595 = vpow2.f32 %v685_v33 }
 0x27b   :  { %v2066_v38 = vadd.f32 %v661_v9, %v557_v36 }
 0x27d   :  { %v705_v44 = vmin.f32 %v2066_v38, 0.0  ;;  %vm701_vm13 = vcmp.gt.f32.partialorder %v2066_v38, 0.0 }
 0x27f   :  { %v1594_v50 = vpop.eup %1593  ;;  %v709_v56 = vmul.f32 1.442695, %v705_v44  ;;  %v1525_v44 = vld [vmem:[%s2203_s4 + $0x28] sm:$0xff] }
 0x280   :  { %v1596_v53 = vpop.eup %1595  ;;  %v696_v58 = vadd.f32 1.0, %v1594_v50 }
 0x281   :  { %v693_v59 = vadd.f32 1.0, %v1596_v53 }
 0x282   :  { %v663_v11 = vpop.f32.mrf.mxu2 }
 0x283   :  { %v2063_v35 = vadd.f32 %v663_v11, %v562_v32  ;;  %v592_v11 = vpop.permute.xlu0 %591 }
 0x285   :  { %v706_v41 = vmin.f32 %v2063_v35, 0.0  ;;  %vm702_vm12 = vcmp.gt.f32.partialorder %v2063_v35, 0.0 }
 0x287   :  { %v711_v51 = vmul.f32 1.442695, %v706_v41  ;;  %v1522_v41 = vld [vmem:[%s2203_s4 + $0x10] sm:$0xff] }
 0x28a   :  { %v666_v13 = vpop.f32.mrf.mxu2 }
 0x28b   :  { %v2057_v29 = vadd.f32 %v666_v13, %v567_v18 }
 0x28d   :  { %v707_v37 = vmin.f32 %v2057_v29, 0.0  ;;  %vm703_vm10 = vcmp.gt.f32.partialorder %v2057_v29, 0.0 }
 0x28f   :  { %v713_v42 = vmul.f32 1.442695, %v707_v37 }
 0x291   :  { %1597 = vpow2.f32 %v713_v42  ;;  %v1523_v42 = vld [vmem:[%s2203_s4 + $0x18] sm:$0xff] }
 0x292   :  { %v668_v22 = vpop.f32.mrf.mxu2 }
 0x293   :  { %v2059_v31 = vadd.f32 %v668_v22, %v572_v28 }
 0x295   :  { %v708_v39 = vmin.f32 %v2059_v31, 0.0  ;;  %vm704_vm11 = vcmp.gt.f32.partialorder %v2059_v31, 0.0 }
 0x297   :  { %v715_v45 = vmul.f32 1.442695, %v708_v39  ;;  %v1598_v60 = vpop.eup %1597 }
 0x298   :  { %v1420_v2 = vadd.f32 -1.0, %v1598_v60  ;;  %v945_v60 = vpop.f32.mrf.mxu0 }
 0x299   :  { %1599 = vpow2.f32 %v715_v45  ;;  %v1527_v45 = vld [vmem:[%s2205_s6 + $0x8] sm:$0xff] }
 0x29a   :  { %v2061_v34 = vpop.f32.mrf.mxu2  ;;  %1601 = vrcp.f32 %v694_v46  ;;  %v723_v17 = vsel %vm703_vm10, %v2057_v29, %v1420_v2 }
 0x29b   :  { %1603 = vpow2.f32 %v711_v51  ;;  %v672_v19 = vadd.f32 %v2061_v34, %v577_v14 }
 0x29c   :  { %1605 = vrcp.f32 %v695_v54 }
 0x29d   :  { %1607 = vpow2.f32 %v709_v56 }
 0x29e   :  { %1609 = vrcp.f32 %v696_v58 }
 0x29f   :  { %v1600_v62 = vpop.eup %1599  ;;  %1611 = vrcp.f32 %v693_v59  ;;  %v770_v59 = vpop.permute.xlu2 %769 }
 0x2a0   :  { %v1602_v63 = vpop.eup %1601  ;;  %v1421_v3 = vadd.f32 -1.0, %v1600_v62 }
 0x2a1   :  { %v1604_v0 = vpop.eup %1603  ;;  %v730_v9 = vsub.f32 1.0, %v1602_v63 }
 0x2a2   :  { %v673_v47 = vpop.f32.mrf.mxu2  ;;  %v1606_v1 = vpop.eup %1605  ;;  %v1419_v8 = vadd.f32 -1.0, %v1604_v0  ;;  %v724_v18 = vsel %vm704_vm11, %v2059_v31, %v1421_v3 }
 0x2a3   :  { %v1608_v4 = vpop.eup %1607  ;;  %v674_v12 = vadd.f32 %v673_v47, %v582_v7  ;;  %v731_v13 = vsub.f32 1.0, %v1606_v1  ;;  %v727_v27 = vmul.f32 %v1606_v1, %v723_v17  ;;  %v947_v3 = vpop.f32.mrf.mxu0 }
 0x2a4   :  { %v1610_v6 = vpop.eup %1609  ;;  %v1418_v15 = vadd.f32 -1.0, %v1608_v4  ;;  %v722_v23 = vsel %vm702_vm12, %v2063_v35, %v1419_v8  ;;  %v1520_v35 = vld [vmem:[%s2203_s4] sm:$0xff] }
 0x2a5   :  { %v1612_v10 = vpop.eup %1611  ;;  %v732_v22 = vsub.f32 1.0, %v1610_v6  ;;  %v734_v25 = vmul.f32 %v730_v9, %v674_v12  ;;  %v728_v28 = vmul.f32 %v1610_v6, %v724_v18  ;;  %v726_v31 = vmul.f32 %v1602_v63, %v722_v23 }
 0x2a6   :  { %v729_v24 = vsub.f32 1.0, %v1612_v10  ;;  %v721_v30 = vsel %vm701_vm13, %v2066_v38, %v1418_v15  ;;  %v1521_v38 = vld [vmem:[%s2203_s4 + $0x8] sm:$0xff] }
 0x2a7   :  { %v725_v34 = vmul.f32 %v1612_v10, %v721_v30  ;;  %v738_v37 = vadd.f32 %v734_v25, %v726_v31 }
 0x2a8   :  { %v733_v32 = vmul.f32 %v729_v24, %v672_v19 }
 0x2aa   :  { %v676_v61 = vpop.f32.mrf.mxu2  ;;  %v737_v39 = vadd.f32 %v733_v32, %v725_v34 }
 0x2ab   :  { %v677_v5 = vadd.f32 %v676_v61, %v587_v57  ;;  %v780_v57 = vpop.permute.xlu0 %779 }
 0x2ac   :  { %v753_v40 = vpack.c.bf16 %v738_v37, %v737_v39 }
 0x2ad   :  { %v735_v20 = vmul.f32 %v731_v13, %v677_v5 }
 0x2af   :  { %v739_v29 = vadd.f32 %v735_v20, %v727_v27 }
 0x2b2   :  { %v678_v16 = vpop.f32.mrf.mxu2 }
 0x2b3   :  { %v679_v21 = vadd.f32 %v678_v16, %v592_v11  ;;  %v775_v0 = vpop.permute.xlu0 %774  ;;  %v785_v16 = vpop.permute.xlu1 %784 }
 0x2b5   :  { %v736_v26 = vmul.f32 %v732_v22, %v679_v21 }
 0x2b7   :  { %v740_v33 = vadd.f32 %v736_v26, %v728_v28 }
 0x2b9   :  { %v754_v36 = vpack.c.bf16 %v740_v33, %v739_v29 }
 0x2bb   :  { %881 = vmatpush.bf16.msra.mxu3 %v754_v36 }
 0x2bf   :  { %882 = vmatpush.bf16.msra.mxu3 %v753_v40 }
 0x2c2   :  { %1446 = vmatmul.msk.bf16.vlgmr.msra.gmra.mxu3 %vm153_vm0, %v1520_v35 }
 0x2c3   :  { %1532 = vmatpush.bf16.msrb.mxu3 %v2083_v52 }
 0x2d2   :  { %1447 = vmatmul.msk.bf16.gmra.mxu3 %vm153_vm0, %v1521_v38 }
 0x2e2   :  { %1448 = vmatmul.msk.bf16.gmra.mxu3 %vm153_vm0, %v1522_v41 }
 0x2f2   :  { %1449 = vmatmul.msk.bf16.gmra.mxu3 %vm153_vm0, %v1523_v42 }
 0x302   :  { %1450 = vmatmul.msk.bf16.gmra.mxu3 %vm153_vm0, %v1524_v43 }
 0x312   :  { %1451 = vmatmul.msk.bf16.gmra.mxu3 %vm153_vm0, %v1525_v44 }
 0x322   :  { %1461 = vmatmul.msk.bf16.vlgmr.msrb.gmra.mxu3 %vm929_vm9, %v1527_v45 }
 0x345   :  { %v884_v46 = vpop.f32.mrf.mxu3 }
 0x346   :  { %v885_v61 = vadd.f32 %v884_v46, %v770_v59 }
 0x348   :  { %v946_v62 = vadd.f32 %v945_v60, %v885_v61 }
 0x34a   :  { %v959_v1 = vmin.f32 %v946_v62, 0.0  ;;  %vm955_vm14 = vcmp.gt.f32.partialorder %v946_v62, 0.0 }
 0x34c   :  { %v963_v4 = vmul.f32 1.442695, %v959_v1 }
 0x34d   :  { %v886_v47 = vpop.f32.mrf.mxu3 }
 0x34e   :  { %v887_v2 = vadd.f32 %v886_v47, %v775_v0  ;;  %1613 = vpow2.f32 %v963_v4 }
 0x350   :  { %v948_v5 = vadd.f32 %v947_v3, %v887_v2 }
 0x352   :  { %v960_v7 = vmin.f32 %v948_v5, 0.0  ;;  %vm956_vm15 = vcmp.gt.f32.partialorder %v948_v5, 0.0 }
 0x354   :  { %v965_v8 = vmul.f32 1.442695, %v960_v7  ;;  %v1614_v11 = vpop.eup %1613 }
 0x355   :  { %v889_v50 = vpop.f32.mrf.mxu3  ;;  %v1462_v14 = vadd.f32 -1.0, %v1614_v11 }
 0x356   :  { %v890_v9 = vadd.f32 %v889_v50, %v780_v57  ;;  %1615 = vpow2.f32 %v965_v8 }
 0x357   :  { %v975_v18 = vsel %vm955_vm14, %v946_v62, %v1462_v14  ;;  %v800_v14 = vpop.permute.xlu1 %799 }
 0x358   :  { %v979_v22 = vsub.f32 0.0, %v975_v18 }
 0x35a   :  { %v983_v28 = vmul.f32 1.442695, %v979_v22 }
 0x35c   :  { %v1616_v20 = vpop.eup %1615 }
 0x35d   :  { %v891_v51 = vpop.f32.mrf.mxu3  ;;  %v1463_v24 = vadd.f32 -1.0, %v1616_v20 }
 0x35e   :  { %v892_v17 = vadd.f32 %v891_v51, %v785_v16 }
 0x35f   :  { %v976_v30 = vsel %vm956_vm15, %v948_v5, %v1463_v24  ;;  %v795_v20 = vpop.permute.xlu1 %794 }
 0x360   :  { %v980_v33 = vsub.f32 0.0, %v976_v30 }
 0x362   :  { %v985_v37 = vmul.f32 1.442695, %v980_v33 }
 0x365   :  { %v2128_v52 = vpop.f32.mrf.mxu3 }
 0x36d   :  { %v2130_v53 = vpop.f32.mrf.mxu3 }
 0x375   :  { %v2132_v54 = vpop.f32.mrf.mxu3 }
 0x37d   :  { %v2134_v55 = vpop.f32.mrf.mxu3 }
 0x385   :  { %v2136_v56 = vpop.f32.mrf.mxu3 }
 0x38d   :  { %v2138_v58 = vpop.f32.mrf.mxu3 }
 0x395   :  { %v2140_v63 = vpop.f32.mrf.mxu3 }
 0x39d   :  { %v2142_v6 = vpop.f32.mrf.mxu3 }
 0x3a5   :  { %v950_v10 = vpop.f32.mrf.mxu3 }
 0x3a6   :  { %v951_v12 = vadd.f32 %v950_v10, %v890_v9 }
 0x3a8   :  { %v961_v13 = vmin.f32 %v951_v12, 0.0  ;;  %vm957_vm0 = vcmp.gt.f32.partialorder %v951_v12, 0.0 }
 0x3aa   :  { %v967_v15 = vmul.f32 1.442695, %v961_v13  ;;  %v1528_v13 = vld [vmem:[%s2205_s6 + $0x10] sm:$0xff] }
 0x3ac   :  { %1617 = vpow2.f32 %v967_v15  ;;  %v790_v15 = vpop.permute.xlu0 %789 }
 0x3ad   :  { %v952_v19 = vpop.f32.mrf.mxu3  ;;  %v895_v16 = vadd.f32 %v2128_v52, %v790_v15 }
 0x3ae   :  { %v953_v21 = vadd.f32 %v952_v19, %v892_v17 }
 0x3b0   :  { %v962_v23 = vmin.f32 %v953_v21, 0.0  ;;  %vm958_vm1 = vcmp.gt.f32.partialorder %v953_v21, 0.0 }
 0x3b2   :  { %v1618_v25 = vpop.eup %1617  ;;  %v969_v26 = vmul.f32 1.442695, %v962_v23 }
 0x3b3   :  { %v1464_v27 = vadd.f32 -1.0, %v1618_v25 }
 0x3b4   :  { %1619 = vpow2.f32 %v969_v26  ;;  %v900_v26 = vadd.f32 %v2132_v54, %v800_v14 }
 0x3b5   :  { %v977_v32 = vsel %vm957_vm0, %v951_v12, %v1464_v27  ;;  %1621 = vpow2.f32 %v983_v28 }
 0x3b6   :  { %v981_v29 = vsub.f32 0.0, %v977_v32 }
 0x3b8   :  { %v987_v31 = vmul.f32 1.442695, %v981_v29 }
 0x3ba   :  { %v1620_v36 = vpop.eup %1619  ;;  %1623 = vpow2.f32 %v987_v31  ;;  %v805_v31 = vpop.permute.xlu2 %804 }
 0x3bb   :  { %v1465_v34 = vadd.f32 -1.0, %v1620_v36  ;;  %v1622_v40 = vpop.eup %1621  ;;  %1625 = vpow2.f32 %v985_v37  ;;  %v902_v36 = vadd.f32 %v2134_v55, %v805_v31 }
 0x3bc   :  { %v991_v42 = vadd.f32 1.0, %v1622_v40 }
 0x3bd   :  { %v978_v39 = vsel %vm958_vm1, %v953_v21, %v1465_v34  ;;  %v897_v21 = vadd.f32 %v2130_v53, %v795_v20 }
 0x3be   :  { %v982_v35 = vsub.f32 0.0, %v978_v39 }
 0x3c0   :  { %v1624_v38 = vpop.eup %1623  ;;  %v989_v41 = vmul.f32 1.442695, %v982_v35 }
 0x3c1   :  { %v993_v43 = vadd.f32 1.0, %v1624_v38  ;;  %v1626_v44 = vpop.eup %1625 }
 0x3c2   :  { %1627 = vpow2.f32 %v989_v41  ;;  %v992_v47 = vadd.f32 1.0, %v1626_v44 }
 0x3c3   :  { %1629 = vrcp.f32 %v993_v43 }
 0x3c4   :  { %1631 = vrcp.f32 %v991_v42 }
 0x3c5   :  { %1633 = vlog2.f32 %v993_v43 }
 0x3c8   :  { %v1628_v45 = vpop.eup %1627 }
 0x3c9   :  { %v1630_v46 = vpop.eup %1629  ;;  %v994_v50 = vadd.f32 1.0, %v1628_v45 }
 0x3ca   :  { %v1007_v51 = vsub.f32 1.0, %v1630_v46  ;;  %v1632_v57 = vpop.eup %1631  ;;  %v1005_v59 = vmul.f32 %v1630_v46, %v2074_v48 }
 0x3cb   :  { %1635 = vrcp.f32 %v994_v50  ;;  %v1634_v61 = vpop.eup %1633 }
 0x3cc   :  { %1637 = vlog2.f32 %v994_v50  ;;  %v1009_v60 = vmul.f32 %v1632_v57, %v1007_v51  ;;  %v1000_v1 = vmul.f32 0.6931472, %v1634_v61 }
 0x3cd   :  { %1639 = vrcp.f32 %v992_v47 }
 0x3ce   :  { %v2145_v62 = vadd.f32 %v1009_v60, %v1005_v59  ;;  %v1003_v9 = vsub.f32 0.0, %v1000_v1 }
 0x3d1   :  { %v1636_v0 = vpop.eup %1635 }
 0x3d2   :  { %v1638_v2 = vpop.eup %1637  ;;  %v1008_v3 = vsub.f32 1.0, %v1636_v0  ;;  %v1006_v7 = vmul.f32 %v1636_v0, %v2079_v49  ;;  %v1529_v49 = vld [vmem:[%s2205_s6 + $0x18] sm:$0xff] }
 0x3d3   :  { %v1640_v4 = vpop.eup %1639  ;;  %v1002_v5 = vmul.f32 0.6931472, %v1638_v2 }
 0x3d4   :  { %v1010_v8 = vmul.f32 %v1640_v4, %v1008_v3 }
 0x3d5   :  { %v1004_v10 = vsub.f32 0.0, %v1002_v5 }
 0x3d6   :  { %v2148_v11 = vadd.f32 %v1010_v8, %v1006_v7 }
 0x3d7   :  { %v2150_v12 = vadd.f32 %v1004_v10, %v1003_v9 }
 0x3d8   :  { %v1026_v48 = vpack.c.bf16 %v2148_v11, %v2145_v62 }
 0x3da   :  { %1050 = vmatpush.bf16.msrb.mxu1 %v1026_v48 }
 0x3dd   :  { %1478 = vmatmul.msk.bf16.vlgmr.msrb.gmra.mxu1 %vm929_vm9, %v1528_v13 }
 0x3ed   :  { %1479 = vmatmul.msk.bf16.gmra.mxu1 %vm929_vm9, %v1529_v49 }
 0x45a   :  { %v1052_v17 = vpop.f32.mrf.mxu1 }
 0x45b   :  { %v1053_v18 = vadd.f32 %v1052_v17, %v895_v16  ;;  %v1014_v16 = vrot.slane %v2150_v12, 4 }
 0x45d   :  { %v1066_v19 = vmin.f32 %v1053_v18, 0.0  ;;  %vm1062_vm2 = vcmp.gt.f32.partialorder %v1053_v18, 0.0 }
 0x45f   :  { %v1070_v22 = vmul.f32 1.442695, %v1066_v19 }
 0x461   :  { %1641 = vpow2.f32 %v1070_v22 }
 0x462   :  { %v1054_v23 = vpop.f32.mrf.mxu1 }
 0x463   :  { %v1055_v24 = vadd.f32 %v1054_v23, %v897_v21  ;;  %v1015_v23 = vadd.f32 %v1014_v16, %v2150_v12 }
 0x465   :  { %v1067_v25 = vmin.f32 %v1055_v24, 0.0  ;;  %vm1063_vm3 = vcmp.gt.f32.partialorder %v1055_v24, 0.0 }
 0x467   :  { %v1072_v27 = vmul.f32 1.442695, %v1067_v25  ;;  %v1642_v30 = vpop.eup %1641 }
 0x468   :  { %v1480_v52 = vadd.f32 -1.0, %v1642_v30 }
 0x469   :  { %1643 = vpow2.f32 %v1072_v27 }
 0x46a   :  { %v1057_v28 = vpop.f32.mrf.mxu1  ;;  %v1082_v53 = vsel %vm1062_vm2, %v1053_v18, %v1480_v52 }
 0x46b   :  { %v1058_v32 = vadd.f32 %v1057_v28, %v900_v26  ;;  %v1086_v40 = vsub.f32 0.0, %v1082_v53  ;;  %v1016_v28 = vrot.slane %v1015_v23, 2 }
 0x46d   :  { %v1068_v29 = vmin.f32 %v1058_v32, 0.0  ;;  %v1090_v43 = vmul.f32 1.442695, %v1086_v40  ;;  %vm1064_vm4 = vcmp.gt.f32.partialorder %v1058_v32, 0.0  ;;  %v1531_v40 = vld [vmem:[%s2205_s6 + $0x28] sm:$0xff] }
 0x46f   :  { %v1074_v33 = vmul.f32 1.442695, %v1068_v29  ;;  %v1644_v37 = vpop.eup %1643  ;;  %v1530_v29 = vld [vmem:[%s2205_s6 + $0x20] sm:$0xff]  ;;  %s1750_s6 = smov [#allocation2]  }
 0x470   :  { %v1481_v54 = vadd.f32 -1.0, %v1644_v37  ;;  %s1242_s2 = sshll.u32 %s1750_s6, 4  ;;  %s1243_s2 = int_to_ptr.vmem [resolvable:$true] %s1242_s2 }
 0x471   :  { %1645 = vpow2.f32 %v1074_v33  ;;  %v1017_v33 = vadd.f32 %v1016_v28, %v1015_v23 }
 0x472   :  { %v1059_v34 = vpop.f32.mrf.mxu1  ;;  %v1083_v44 = vsel %vm1063_vm3, %v1055_v24, %v1481_v54  ;;  %v810_v54 = vpop.permute.xlu1 %809 }
 0x473   :  { %v1060_v39 = vadd.f32 %v1059_v34, %v902_v36  ;;  %v1087_v55 = vsub.f32 0.0, %v1083_v44  ;;  %v1018_v31 = vrot.slane %v1017_v33, 1 }
 0x475   :  { %v1069_v35 = vmin.f32 %v1060_v39, 0.0  ;;  %v1092_v57 = vmul.f32 1.442695, %v1087_v55  ;;  %vm1065_vm5 = vcmp.gt.f32.partialorder %v1060_v39, 0.0  ;;  %v1019_v34 = vadd.f32 %v1018_v31, %v1017_v33 }
 0x477   :  { %v1646_v38 = vpop.eup %1645  ;;  %v1076_v41 = vmul.f32 1.442695, %v1069_v35  ;;  %v820_v35 = vpop.permute.xlu2 %819 }
 0x478   :  { %v1482_v42 = vadd.f32 -1.0, %v1646_v38  ;;  %v905_v38 = vadd.f32 %v2136_v56, %v810_v54 }
 0x479   :  { %1647 = vpow2.f32 %v1076_v41 }
 0x47a   :  { %v1084_v45 = vsel %vm1064_vm4, %v1058_v32, %v1482_v42  ;;  %1649 = vpow2.f32 %v1090_v43 }
 0x47b   :  { %v1088_v46 = vsub.f32 0.0, %v1084_v45 }
 0x47d   :  { %v1094_v47 = vmul.f32 1.442695, %v1088_v46 }
 0x47f   :  { %v1648_v50 = vpop.eup %1647  ;;  %1651 = vpow2.f32 %v1094_v47  ;;  %v815_v44 = vpop.permute.xlu2 %814 }
 0x480   :  { %v1483_v51 = vadd.f32 -1.0, %v1648_v50  ;;  %v1650_v60 = vpop.eup %1649  ;;  %1653 = vpow2.f32 %v1092_v57  ;;  %v907_v45 = vadd.f32 %v2138_v58, %v815_v44 }
 0x481   :  { %v1098_v2 = vadd.f32 1.0, %v1650_v60 }
 0x482   :  { %v1085_v59 = vsel %vm1065_vm5, %v1060_v39, %v1483_v51  ;;  %v910_v51 = vadd.f32 %v2140_v63, %v820_v35 }
 0x483   :  { %v1089_v61 = vsub.f32 0.0, %v1085_v59 }
 0x485   :  { %v1652_v0 = vpop.eup %1651  ;;  %v1096_v1 = vmul.f32 1.442695, %v1089_v61 }
 0x486   :  { %v1100_v3 = vadd.f32 1.0, %v1652_v0  ;;  %v1654_v4 = vpop.eup %1653 }
 0x487   :  { %1655 = vpow2.f32 %v1096_v1  ;;  %v1099_v8 = vadd.f32 1.0, %v1654_v4 }
 0x488   :  { %1657 = vrcp.f32 %v1100_v3 }
 0x489   :  { %1659 = vrcp.f32 %v1098_v2  ;;  %v825_v2 = vpop.permute.xlu0 %824 }
 0x48a   :  { %1661 = vlog2.f32 %v1100_v3  ;;  %v912_v3 = vadd.f32 %v2142_v6, %v825_v2 }
 0x48d   :  { %v1656_v5 = vpop.eup %1655 }
 0x48e   :  { %v1658_v7 = vpop.eup %1657  ;;  %v1101_v9 = vadd.f32 1.0, %v1656_v5 }
 0x48f   :  { %v1114_v10 = vsub.f32 1.0, %v1658_v7  ;;  %v1660_v48 = vpop.eup %1659  ;;  %v1112_v13 = vmul.f32 %v1658_v7, %v2145_v62 }
 0x490   :  { %1663 = vrcp.f32 %v1101_v9  ;;  %v1662_v14 = vpop.eup %1661 }
 0x491   :  { %1665 = vlog2.f32 %v1101_v9  ;;  %v1116_v49 = vmul.f32 %v1660_v48, %v1114_v10  ;;  %v1107_v18 = vmul.f32 0.6931472, %v1662_v14 }
 0x492   :  { %1667 = vrcp.f32 %v1099_v8 }
 0x493   :  { %v2167_v15 = vadd.f32 %v1116_v49, %v1112_v13  ;;  %v1110_v26 = vsub.f32 0.0, %v1107_v18 }
 0x496   :  { %v1664_v17 = vpop.eup %1663 }
 0x497   :  { %v1666_v19 = vpop.eup %1665  ;;  %v1115_v20 = vsub.f32 1.0, %v1664_v17  ;;  %v1113_v24 = vmul.f32 %v1664_v17, %v2148_v11 }
 0x498   :  { %v1668_v21 = vpop.eup %1667  ;;  %v1109_v22 = vmul.f32 0.6931472, %v1666_v19 }
 0x499   :  { %v1117_v25 = vmul.f32 %v1668_v21, %v1115_v20 }
 0x49a   :  { %v1111_v62 = vsub.f32 0.0, %v1109_v22 }
 0x49b   :  { %v2172_v27 = vadd.f32 %v1117_v25, %v1113_v24 }
 0x49c   :  { %v1120_v30 = vadd.f32 %v1111_v62, %v1110_v26 }
 0x49d   :  { %v1133_v32 = vpack.c.bf16 %v2172_v27, %v2167_v15 }
 0x49e   :  { %v1121_v52 = vrot.slane %v1120_v30, 4 }
 0x49f   :  { %1157 = vmatpush.bf16.msrb.mxu2 %v1133_v32 }
 0x4a0   :  { %v1122_v12 = vadd.f32 %v1121_v52, %v1120_v30 }
 0x4a2   :  { %1496 = vmatmul.msk.bf16.vlgmr.msrb.gmra.mxu2 %vm929_vm9, %v1530_v29  ;;  %v1123_v11 = vrot.slane %v1122_v12, 2 }
 0x4a4   :  { %v1124_v36 = vadd.f32 %v1123_v11, %v1122_v12 }
 0x4a6   :  { %v1125_v53 = vrot.slane %v1124_v36, 1 }
 0x4a8   :  { %v1126_v37 = vadd.f32 %v1125_v53, %v1124_v36 }
 0x4aa   :  { %v2180_v39 = vadd.f32 %v1126_v37, %v1019_v34 }
 0x4b2   :  { %1497 = vmatmul.msk.bf16.gmra.mxu2 %vm929_vm9, %v1531_v40 }
 0x525   :  { %v1159_v41 = vpop.f32.mrf.mxu2 }
 0x526   :  { %v1160_v42 = vadd.f32 %v1159_v41, %v905_v38 }
 0x528   :  { %v1173_v43 = vmin.f32 %v1160_v42, 0.0  ;;  %vm1169_vm6 = vcmp.gt.f32.partialorder %v1160_v42, 0.0 }
 0x52a   :  { %v1177_v46 = vmul.f32 1.442695, %v1173_v43 }
 0x52c   :  { %1669 = vpow2.f32 %v1177_v46 }
 0x52d   :  { %v1161_v55 = vpop.f32.mrf.mxu2 }
 0x52e   :  { %v1162_v47 = vadd.f32 %v1161_v55, %v907_v45 }
 0x530   :  { %v1174_v50 = vmin.f32 %v1162_v47, 0.0  ;;  %vm1170_vm7 = vcmp.gt.f32.partialorder %v1162_v47, 0.0 }
 0x532   :  { %v1179_v57 = vmul.f32 1.442695, %v1174_v50  ;;  %v1670_v60 = vpop.eup %1669 }
 0x533   :  { %v1498_v56 = vadd.f32 -1.0, %v1670_v60 }
 0x534   :  { %1671 = vpow2.f32 %v1179_v57 }
 0x535   :  { %v1164_v59 = vpop.f32.mrf.mxu2  ;;  %v1189_v58 = vsel %vm1169_vm6, %v1160_v42, %v1498_v56 }
 0x536   :  { %v1165_v61 = vadd.f32 %v1164_v59, %v910_v51  ;;  %v1193_v8 = vsub.f32 0.0, %v1189_v58 }
 0x538   :  { %v1175_v0 = vmin.f32 %v1165_v61, 0.0  ;;  %v1197_v49 = vmul.f32 1.442695, %v1193_v8  ;;  %vm1171_vm8 = vcmp.gt.f32.partialorder %v1165_v61, 0.0 }
 0x53a   :  { %v1181_v1 = vmul.f32 1.442695, %v1175_v0  ;;  %v1672_v5 = vpop.eup %1671 }
 0x53b   :  { %v1499_v63 = vadd.f32 -1.0, %v1672_v5 }
 0x53c   :  { %1673 = vpow2.f32 %v1181_v1 }
 0x53d   :  { %v1166_v4 = vpop.f32.mrf.mxu2  ;;  %v1190_v14 = vsel %vm1170_vm7, %v1162_v47, %v1499_v63 }
 0x53e   :  { %v1167_v7 = vadd.f32 %v1166_v4, %v912_v3  ;;  %v1194_v6 = vsub.f32 0.0, %v1190_v14 }
 0x540   :  { %v1176_v9 = vmin.f32 %v1167_v7, 0.0  ;;  %v1199_v21 = vmul.f32 1.442695, %v1194_v6  ;;  %vm1172_vm9 = vcmp.gt.f32.partialorder %v1167_v7, 0.0 }
 0x542   :  { %v1674_v10 = vpop.eup %1673  ;;  %v1183_v48 = vmul.f32 1.442695, %v1176_v9 }
 0x543   :  { %v1500_v13 = vadd.f32 -1.0, %v1674_v10 }
 0x544   :  { %1675 = vpow2.f32 %v1183_v48 }
 0x545   :  { %v1191_v16 = vsel %vm1171_vm8, %v1165_v61, %v1500_v13  ;;  %1677 = vpow2.f32 %v1197_v49 }
 0x546   :  { %v1195_v17 = vsub.f32 0.0, %v1191_v16 }
 0x548   :  { %v1201_v18 = vmul.f32 1.442695, %v1195_v17 }
 0x54a   :  { %v1676_v19 = vpop.eup %1675  ;;  %1679 = vpow2.f32 %v1201_v18 }
 0x54b   :  { %v1501_v20 = vadd.f32 -1.0, %v1676_v19  ;;  %v1678_v23 = vpop.eup %1677  ;;  %1681 = vpow2.f32 %v1199_v21 }
 0x54c   :  { %v1205_v62 = vadd.f32 1.0, %v1678_v23 }
 0x54d   :  { %v1192_v22 = vsel %vm1172_vm9, %v1167_v7, %v1501_v20 }
 0x54e   :  { %v1196_v24 = vsub.f32 0.0, %v1192_v22 }
 0x550   :  { %v1680_v25 = vpop.eup %1679  ;;  %v1203_v26 = vmul.f32 1.442695, %v1196_v24 }
 0x551   :  { %v1207_v28 = vadd.f32 1.0, %v1680_v25  ;;  %v1682_v30 = vpop.eup %1681 }
 0x552   :  { %1683 = vpow2.f32 %v1203_v26  ;;  %v1206_v52 = vadd.f32 1.0, %v1682_v30 }
 0x553   :  { %1685 = vrcp.f32 %v1207_v28 }
 0x554   :  { %1687 = vrcp.f32 %v1205_v62 }
 0x555   :  { %1689 = vlog2.f32 %v1207_v28 }
 0x558   :  { %v1684_v32 = vpop.eup %1683 }
 0x559   :  { %v1686_v29 = vpop.eup %1685  ;;  %v1208_v33 = vadd.f32 1.0, %v1684_v32 }
 0x55a   :  { %v1221_v12 = vsub.f32 1.0, %v1686_v29  ;;  %v1688_v11 = vpop.eup %1687  ;;  %v1219_v31 = vmul.f32 %v1686_v29, %v2167_v15 }
 0x55b   :  { %1691 = vrcp.f32 %v1208_v33  ;;  %v1690_v53 = vpop.eup %1689 }
 0x55c   :  { %1693 = vlog2.f32 %v1208_v33  ;;  %v1223_v36 = vmul.f32 %v1688_v11, %v1221_v12  ;;  %v1214_v40 = vmul.f32 0.6931472, %v1690_v53 }
 0x55d   :  { %1695 = vrcp.f32 %v1206_v52 }
 0x55e   :  { %v1225_v34 = vadd.f32 %v1223_v36, %v1219_v31  ;;  %v1217_v43 = vsub.f32 0.0, %v1214_v40 }
 0x560   :  { %1235 = vst [vmem:[#allocation2] sm:$0xff] %v1225_v34 }
 0x561   :  { %v1692_v37 = vpop.eup %1691 }
 0x562   :  { %v1694_v35 = vpop.eup %1693  ;;  %v1222_v54 = vsub.f32 1.0, %v1692_v37  ;;  %v1220_v42 = vmul.f32 %v1692_v37, %v2172_v27 }
 0x563   :  { %v1696_v38 = vpop.eup %1695  ;;  %v1216_v41 = vmul.f32 0.6931472, %v1694_v35 }
 0x564   :  { %v1224_v15 = vmul.f32 %v1696_v38, %v1222_v54 }
 0x565   :  { %v1218_v44 = vsub.f32 0.0, %v1216_v41 }
 0x566   :  { %v1226_v45 = vadd.f32 %v1224_v15, %v1220_v42 }
 0x567   :  { %v1227_v46 = vadd.f32 %v1218_v44, %v1217_v43 }
 0x568   :  { %1236 = vst [vmem:[#allocation2 + $0x8] sm:$0xff] %v1226_v45 }
 0x569   :  { %1250 = dma.vmem_to_hbm [thread:$0]  %s1243_s2, 256, %s1245_s27, [#allocation3], %s1751_s28, %s1751_s28, %s1752_s29   ;;  %v1228_v55 = vrot.slane %v1227_v46, 4 }
 0x56b   :  { %v1229_v47 = vadd.f32 %v1228_v55, %v1227_v46 }
 0x56d   :  { %v1230_v50 = vrot.slane %v1229_v47, 2 }
 0x56f   :  { %v1231_v51 = vadd.f32 %v1230_v50, %v1229_v47 }
 0x571   :  { %v1232_v57 = vrot.slane %v1231_v51, 1 }
 0x573   :  { %v1233_v27 = vadd.f32 %v1232_v57, %v1231_v51 }
 0x575   :  { %v1234_v59 = vadd.f32 %v1233_v27, %v2180_v39 }
 0x577   :  { %1237 = vst [vmem:[#allocation4] sm:$0xff] %v1234_v59 }
 0x578   :  { %1261 = dma.vmem_to_hbm [thread:$0]  %s1257_s0, 128, %s1259_s10, [#allocation5]  }
 0x579   :  { %1745 = dma.done.wait [#allocation3], 256  }
 0x57a   :  { %1746 = vsyncadd [#allocation3], 4294967040 }
 0x57b   :  { %1747 = dma.done.wait [#allocation5], 128  }
 0x57c   :  { %1748 = vsyncadd [#allocation5], 4294967168 }
 0x57d   :  { %1270 = vsyncpa [#allocation3], 1 }
 0x57e   :  { %1271 = vsyncpa [#allocation5], 1 }

</bundles_post_ra>
